<compile_context>
chip_gen: v5e
topology: v5e:2x2
jax: 0.10.0
libtpu: 0.0.40
codegen_flags: <defaults>
</compile_context>

<pallas_src>
from functools import partial

import jax
import jax.numpy as jnp
from jax.experimental import pallas as pl
from jax.experimental.pallas import tpu as pltpu


def _round_up(n, m):
    return ((n + m - 1) // m) * m


# ---------------------------------------------------------------------------
# Fused Pallas kernel: whole ConvolutionInflationBlock for one batch element
# ---------------------------------------------------------------------------

def _fused_kernel(xp_ref, w2_ref, b2_ref, g2_ref, w1_ref, b1_ref, g1_ref,
                  wp_ref, bp_ref, ssum_ref, o_ref, *, ks2, ks1, cp):
    """Packed-lane layout (last dim = W*cp; the input additionally carries a W halo).

    xp_ref : (1, T, H+2*p2, (W+2*p2)*cp)  spatially halo-padded, channel-padded+packed input
    w2_ref : (ks2, (W+2*p2)*cp, W*cp)     spatial conv: banded (dx,cin)->(w,cout) matrix per dy
    b2_ref, g2_ref : (1, W*cp)            bias / (gamma*sqrt(C)) tiled over w
    w1_ref : (ks1, W*cp, W*cp)            temporal conv: block-diag cin->cout matrix per dt
    b1_ref, g1_ref : (1, W*cp)
    wp_ref : (W*cp, W*cp)                 proj_out 1x1, block-diagonal
    bp_ref : (1, W*cp)
    ssum_ref : (W*cp, W*cp)               kron(I_W, ones(cp,cp)): per-location channel sumsq,
                                          broadcast back to every lane of its channel group
    o_ref  : (1, T, H, W*cp)
    """
    _, T, H, WCp = o_ref.shape
    p2, p1 = ks2 // 2, ks1 // 2
    wp2cp = xp_ref.shape[-1]

    def silu(v):
        return v / (1.0 + jnp.exp(-v))

    # ---- spatial KxK conv: per-dy accumulated banded matmuls (no im2col concat) -------
    acc = None
    for dy in range(ks2):
        xd = xp_ref[0, :, dy:dy + H, :].reshape(T * H, wp2cp)
        m = jnp.dot(xd, w2_ref[dy], preferred_element_type=jnp.float32)
        acc = m if acc is None else acc + m
    y = acc + b2_ref[...]                                        # (T*H, W*cp)

    # channel RMSNorm: F.normalize over channels * sqrt(C) * gamma (scale folded into gamma).
    # per-(t,h,w) channel sum-of-squares via a block-diag ones matmul -> stays lane-dense.
    ss = jnp.dot(y * y, ssum_ref[...], preferred_element_type=jnp.float32)
    y = y * jax.lax.rsqrt(jnp.maximum(ss, 1e-24)) * g2_ref[...]
    y = silu(y)

    # ---- temporal K-tap conv: per-dt accumulated block-diag matmuls over shifted T rows ----
    y3 = y.reshape(T, H, WCp)
    if p1 > 0:
        zhalo = jnp.zeros((p1, H, WCp), jnp.float32)
        ypad = jnp.concatenate([zhalo, y3, zhalo], axis=0)       # (T+2*p1, H, W*cp)
    else:
        ypad = y3
    acc = None
    for dt in range(ks1):
        m = jnp.dot(ypad[dt:dt + T].reshape(T * H, WCp), w1_ref[dt],
                    preferred_element_type=jnp.float32)
        acc = m if acc is None else acc + m
    z = acc + b1_ref[...]

    ss = jnp.dot(z * z, ssum_ref[...], preferred_element_type=jnp.float32)
    z = z * jax.lax.rsqrt(jnp.maximum(ss, 1e-24)) * g1_ref[...]
    z = silu(z)

    # ---- proj_out (1x1) + residual ----------------------------------------------------
    out = jnp.dot(z, wp_ref[...], preferred_element_type=jnp.float32) + bp_ref[...]
    # residual = centre tap of the halo-padded input; loaded late (short live range).
    res = xp_ref[0, :, p2:p2 + H, p2 * cp:p2 * cp + WCp]
    o_ref[0] = out.reshape(T, H, WCp) + res


# ---------------------------------------------------------------------------
# Wrapper
# ---------------------------------------------------------------------------

@jax.jit
def conv_inflation_block(x, w2, b2, g2, w1, b1, g1, wp, bp):
    """Forward of ConvolutionInflationBlock for video input x: (B, C, T, H, W), float32."""
    B, C, T, H, W = x.shape
    ks2, ks1 = w2.shape[-1], w1.shape[-1]
    p2 = ks2 // 2
    f32 = jnp.float32

    # Smallest Cp >= C (multiple of 8) such that W*Cp is a multiple of 128: the packed
    # (w, c) lane axis is dense without inflating the channel count to 128.
    Cp = _round_up(max(C, 1), 8)
    while (W * Cp) % 128 != 0:
        Cp += 8
    cpad = Cp - C
    scale = float(C) ** 0.5
    Hp2, Wp2 = H + 2 * p2, W + 2 * p2
    WCp = W * Cp

    # ---- input: NCTHW -> (B, T, Hp2, Wp2*Cp), halo + channel zero-pad, packed lanes ----
    xl = jnp.transpose(x, (0, 2, 3, 4, 1))                                    # (B,T,H,W,C)
    xp = jnp.pad(xl, ((0, 0), (0, 0), (p2, p2), (p2, p2), (0, cpad)))
    xp = xp.reshape(B, T, Hp2, Wp2 * Cp)

    # ---- weights (all built with multiplies/gathers only -> exact f32) -----------------
    # spatial: Wband[dy, (w+dx)*Cp+cin, w*Cp+cout] = w2[cout, cin, dy, dx]
    w2p = jnp.pad(jnp.transpose(w2, (2, 3, 1, 0)).astype(f32),
                  ((0, 0), (0, 0), (0, cpad), (0, cpad)))                     # (ks2,ks2,Cp,Cp)
    dxs = jnp.arange(Wp2)[:, None] - jnp.arange(W)[None, :]                   # dx = v - w
    valid = (dxs >= 0) & (dxs < ks2)
    w2g = w2p[:, jnp.clip(dxs, 0, ks2 - 1)]                                   # (ks2,Wp2,W,Cp,Cp)
    w2g = jnp.where(valid[None, :, :, None, None], w2g, 0.0)
    w2band = jnp.transpose(w2g, (0, 1, 3, 2, 4)).reshape(ks2, Wp2 * Cp, WCp)

    eyeW = jnp.eye(W, dtype=f32)

    def kron_eye(blk):  # (..., Cp, Cp) -> (..., W*Cp, W*Cp), block-diagonal (pure multiplies)
        out = eyeW[:, None, :, None] * blk[..., None, :, None, :]
        return out.reshape(blk.shape[:-2] + (WCp, WCp))

    w1p = jnp.pad(jnp.transpose(w1, (2, 1, 0)).astype(f32),
                  ((0, 0), (0, cpad), (0, cpad)))                             # (ks1, Cp, Cp)
    w1blk = kron_eye(w1p)                                                     # (ks1, WCp, WCp)
    wpblk = kron_eye(jnp.pad(wp.T.astype(f32), ((0, cpad), (0, cpad))))       # (WCp, WCp)
    ssum = kron_eye(jnp.ones((Cp, Cp), f32))                                  # (WCp, WCp)

    def packvec(v, s=1.0):  # per-channel vector -> (1, W*Cp), tiled over w, padded chans = 0
        return jnp.tile(jnp.pad(v.astype(f32) * s, (0, cpad)), W).reshape(1, WCp)

    b2p, b1p, bpp = packvec(b2), packvec(b1), packvec(bp)
    g2p, g1p = packvec(g2, scale), packvec(g1, scale)          # fold sqrt(C) into gamma

    out = pl.pallas_call(
        partial(_fused_kernel, ks2=ks2, ks1=ks1, cp=Cp),
        out_shape=jax.ShapeDtypeStruct((B, T, H, WCp), jnp.float32),
        grid=(B,),
        in_specs=[
            pl.BlockSpec((1, T, Hp2, Wp2 * Cp), lambda b: (b, 0, 0, 0)),
            pl.BlockSpec((ks2, Wp2 * Cp, WCp), lambda b: (0, 0, 0)),
            pl.BlockSpec((1, WCp), lambda b: (0, 0)),
            pl.BlockSpec((1, WCp), lambda b: (0, 0)),
            pl.BlockSpec((ks1, WCp, WCp), lambda b: (0, 0, 0)),
            pl.BlockSpec((1, WCp), lambda b: (0, 0)),
            pl.BlockSpec((1, WCp), lambda b: (0, 0)),
            pl.BlockSpec((WCp, WCp), lambda b: (0, 0)),
            pl.BlockSpec((1, WCp), lambda b: (0, 0)),
            pl.BlockSpec((WCp, WCp), lambda b: (0, 0)),
        ],
        out_specs=pl.BlockSpec((1, T, H, WCp), lambda b: (b, 0, 0, 0)),
        compiler_params=pltpu.CompilerParams(
            dimension_semantics=("parallel",),
            vmem_limit_bytes=32 * 1024 * 1024),
    )(xp, w2band, b2p, g2p, w1blk, b1p, g1p, wpblk, bpp, ssum)

    # unpack lanes, drop channel padding, back to (B, C, T, H, W)
    out = out.reshape(B, T, H, W, Cp)[..., :C]
    return jnp.transpose(out, (0, 4, 1, 2, 3))


# ---------------------------------------------------------------------------
# Pure-JAX reference (for correctness check) -- full f32 precision
# ---------------------------------------------------------------------------

def reference(x, w2, b2, g2, w1, b1, g1, wp, bp):
    B, C, T, H, W = x.shape
    scale = float(C) ** 0.5
    hp = jax.lax.Precision.HIGHEST

    xs = jnp.transpose(x, (0, 2, 1, 3, 4)).reshape(B * T, C, H, W)            # (bt, c, h, w)
    y = jax.lax.conv_general_dilated(xs, w2, (1, 1), "SAME",
                                     dimension_numbers=("NCHW", "OIHW", "NCHW"),
                                     precision=hp)
    y = y + b2.reshape(1, C, 1, 1)
    n = jnp.maximum(jnp.sqrt(jnp.sum(y * y, axis=1, keepdims=True)), 1e-12)   # over channels
    y = y / n * scale * g2.reshape(1, C, 1, 1)
    y = y * jax.nn.sigmoid(y)

    y = y.reshape(B, T, C, H, W).transpose(0, 3, 4, 2, 1).reshape(B * H * W, C, T)
    y = jax.lax.conv_general_dilated(y, w1, (1,), "SAME",
                                     dimension_numbers=("NCH", "OIH", "NCH"),
                                     precision=hp)
    y = y + b1.reshape(1, C, 1)
    n = jnp.maximum(jnp.sqrt(jnp.sum(y * y, axis=1, keepdims=True)), 1e-12)   # over channels
    y = y / n * scale * g1.reshape(1, C, 1)
    y = y * jax.nn.sigmoid(y)

    y = jnp.einsum("oc,nct->not", wp, y, precision=hp) + bp.reshape(1, C, 1)
    y = y.reshape(B, H, W, C, T).transpose(0, 3, 4, 1, 2)                     # (b, c, t, h, w)
    return y + x


# ---------------------------------------------------------------------------
# Main
# ---------------------------------------------------------------------------

if __name__ == "__main__":
    key = jax.random.PRNGKey(0)
    keys = jax.random.split(key, 7)

    B, C, T, H, W = 2, 8, 8, 8, 8
    ks2 = ks1 = 3

    x = jax.random.normal(keys[0], (B, C, T, H, W), jnp.float32)

    # Parameters (deterministic).  Shapes follow the module's __init__.
    w2 = 0.1 * jax.random.normal(keys[1], (C, C, ks2, ks2), jnp.float32)  # Conv2d (O, I, Kh, Kw)
    b2 = 0.1 * jax.random.normal(keys[2], (C,), jnp.float32)
    g2 = jnp.ones((C,), jnp.float32)                                      # spatial RMSNorm gamma
    w1 = 0.1 * jax.random.normal(keys[3], (C, C, ks1), jnp.float32)       # Conv1d (O, I, K)
    b1 = 0.1 * jax.random.normal(keys[4], (C,), jnp.float32)
    g1 = jnp.ones((C,), jnp.float32)
    # NOTE: the original module zero-inits proj_out (block is exactly identity at init);
    # small nonzero values are used here so the full compute path is exercised.
    wp = 0.1 * jax.random.normal(keys[5], (C, C), jnp.float32)            # Conv1d 1x1 (O, I)
    bp = 0.1 * jax.random.normal(keys[6], (C,), jnp.float32)

    out = conv_inflation_block(x, w2, b2, g2, w1, b1, g1, wp, bp)
    jax.block_until_ready(out)

    ref = reference(x, w2, b2, g2, w1, b1, g1, wp, bp)
    assert out.shape == x.shape, (out.shape, x.shape)
    max_err = float(jnp.max(jnp.abs(out - ref)))
    # Everything in the kernel is f32; with full-precision MXU passes the observed error is
    # ~1e-5.  The 2e-2 bound only covers the case where the backend evaluates f32 matmuls
    # with reduced-precision (bf16) passes; any real bug (wrong tap / axis / lane offset)
    # shows up as an O(0.1-1) error and still fails this check.
    assert max_err < 2e-2, f"max abs err vs pure-JAX reference: {max_err}"

    print("KERNEL_OK")
</pallas_src>

<mosaic_0001>
module attributes {stable_mosaic.version = 11 : i64} {
  func.func @_fused_kernel(%arg0: i32, %arg1: memref<1x8x10x160xf32, #tpu.memory_space<vmem>>, %arg2: memref<3x160x128xf32, #tpu.memory_space<vmem>>, %arg3: memref<1x128xf32, #tpu.memory_space<vmem>>, %arg4: memref<1x128xf32, #tpu.memory_space<vmem>>, %arg5: memref<3x128x128xf32, #tpu.memory_space<vmem>>, %arg6: memref<1x128xf32, #tpu.memory_space<vmem>>, %arg7: memref<1x128xf32, #tpu.memory_space<vmem>>, %arg8: memref<128x128xf32, #tpu.memory_space<vmem>>, %arg9: memref<1x128xf32, #tpu.memory_space<vmem>>, %arg10: memref<128x128xf32, #tpu.memory_space<vmem>>, %arg11: memref<1x8x8x128xf32, #tpu.memory_space<vmem>>) attributes {dimension_semantics = [#tpu.dimension_semantics<parallel>], iteration_bounds = array<i64: 2>, scalar_prefetch = 0 : i64, scratch_operands = 0 : i64, tpu.core_type = #tpu.core_type<tc>, window_params = [{transform_indices = @transform_0, window_bounds = array<i64: 1, 8, 10, 160>}, {pipeline_mode = #tpu.pipeline_mode<synchronous>, transform_indices = @transform_1, window_bounds = array<i64: 3, 160, 128>}, {pipeline_mode = #tpu.pipeline_mode<synchronous>, transform_indices = @transform_2, window_bounds = array<i64: 1, 128>}, {pipeline_mode = #tpu.pipeline_mode<synchronous>, transform_indices = @transform_3, window_bounds = array<i64: 1, 128>}, {pipeline_mode = #tpu.pipeline_mode<synchronous>, transform_indices = @transform_4, window_bounds = array<i64: 3, 128, 128>}, {pipeline_mode = #tpu.pipeline_mode<synchronous>, transform_indices = @transform_5, window_bounds = array<i64: 1, 128>}, {pipeline_mode = #tpu.pipeline_mode<synchronous>, transform_indices = @transform_6, window_bounds = array<i64: 1, 128>}, {pipeline_mode = #tpu.pipeline_mode<synchronous>, transform_indices = @transform_7, window_bounds = array<i64: 128, 128>}, {pipeline_mode = #tpu.pipeline_mode<synchronous>, transform_indices = @transform_8, window_bounds = array<i64: 1, 128>}, {pipeline_mode = #tpu.pipeline_mode<synchronous>, transform_indices = @transform_9, window_bounds = array<i64: 128, 128>}, {transform_indices = @transform_10, window_bounds = array<i64: 1, 8, 8, 128>}]} {
    %c0 = arith.constant 0 : index
    %c0_0 = arith.constant 0 : index
    %c0_1 = arith.constant 0 : index
    %c0_2 = arith.constant 0 : index
    %0 = vector.load %arg1[%c0, %c0_0, %c0_1, %c0_2] : memref<1x8x10x160xf32, #tpu.memory_space<vmem>>, vector<1x8x8x160xf32>
    %1 = vector.shape_cast %0 : vector<1x8x8x160xf32> to vector<8x8x160xf32>
    %2 = vector.shape_cast %1 : vector<8x8x160xf32> to vector<64x160xf32>
    %c0_3 = arith.constant 0 : index
    %c0_4 = arith.constant 0 : index
    %c0_5 = arith.constant 0 : index
    %3 = vector.load %arg2[%c0_3, %c0_4, %c0_5] : memref<3x160x128xf32, #tpu.memory_space<vmem>>, vector<1x160x128xf32>
    %4 = vector.shape_cast %3 : vector<1x160x128xf32> to vector<160x128xf32>
    %cst = arith.constant dense<0.000000e+00> : vector<64x128xf32>
    %5 = tpu.matmul %2, %4, %cst {dimension_numbers = #tpu.dot_dimension_numbers<[1], [0], [0], [1], [0, 0, 1, 1], [], []>} : vector<64x160xf32>, vector<160x128xf32>, vector<64x128xf32> -> vector<64x128xf32>
    %c0_6 = arith.constant 0 : index
    %c0_7 = arith.constant 0 : index
    %c1 = arith.constant 1 : index
    %c0_8 = arith.constant 0 : index
    %6 = vector.load %arg1[%c0_6, %c0_7, %c1, %c0_8] : memref<1x8x10x160xf32, #tpu.memory_space<vmem>>, vector<1x8x8x160xf32>
    %7 = vector.shape_cast %6 : vector<1x8x8x160xf32> to vector<8x8x160xf32>
    %8 = vector.shape_cast %7 : vector<8x8x160xf32> to vector<64x160xf32>
    %c1_9 = arith.constant 1 : index
    %c0_10 = arith.constant 0 : index
    %c0_11 = arith.constant 0 : index
    %9 = vector.load %arg2[%c1_9, %c0_10, %c0_11] : memref<3x160x128xf32, #tpu.memory_space<vmem>>, vector<1x160x128xf32>
    %10 = vector.shape_cast %9 : vector<1x160x128xf32> to vector<160x128xf32>
    %cst_12 = arith.constant dense<0.000000e+00> : vector<64x128xf32>
    %11 = tpu.matmul %8, %10, %cst_12 {dimension_numbers = #tpu.dot_dimension_numbers<[1], [0], [0], [1], [0, 0, 1, 1], [], []>} : vector<64x160xf32>, vector<160x128xf32>, vector<64x128xf32> -> vector<64x128xf32>
    %12 = arith.addf %5, %11 : vector<64x128xf32>
    %c0_13 = arith.constant 0 : index
    %c0_14 = arith.constant 0 : index
    %c2 = arith.constant 2 : index
    %c0_15 = arith.constant 0 : index
    %13 = vector.load %arg1[%c0_13, %c0_14, %c2, %c0_15] : memref<1x8x10x160xf32, #tpu.memory_space<vmem>>, vector<1x8x8x160xf32>
    %14 = vector.shape_cast %13 : vector<1x8x8x160xf32> to vector<8x8x160xf32>
    %15 = vector.shape_cast %14 : vector<8x8x160xf32> to vector<64x160xf32>
    %c2_16 = arith.constant 2 : index
    %c0_17 = arith.constant 0 : index
    %c0_18 = arith.constant 0 : index
    %16 = vector.load %arg2[%c2_16, %c0_17, %c0_18] : memref<3x160x128xf32, #tpu.memory_space<vmem>>, vector<1x160x128xf32>
    %17 = vector.shape_cast %16 : vector<1x160x128xf32> to vector<160x128xf32>
    %cst_19 = arith.constant dense<0.000000e+00> : vector<64x128xf32>
    %18 = tpu.matmul %15, %17, %cst_19 {dimension_numbers = #tpu.dot_dimension_numbers<[1], [0], [0], [1], [0, 0, 1, 1], [], []>} : vector<64x160xf32>, vector<160x128xf32>, vector<64x128xf32> -> vector<64x128xf32>
    %19 = arith.addf %12, %18 : vector<64x128xf32>
    %c0_20 = arith.constant 0 : index
    %c0_21 = arith.constant 0 : index
    %20 = vector.load %arg3[%c0_20, %c0_21] : memref<1x128xf32, #tpu.memory_space<vmem>>, vector<1x128xf32>
    %21 = vector.broadcast %20 : vector<1x128xf32> to vector<64x128xf32>
    %22 = arith.addf %19, %21 : vector<64x128xf32>
    %23 = arith.mulf %22, %22 : vector<64x128xf32>
    %c0_22 = arith.constant 0 : index
    %c0_23 = arith.constant 0 : index
    %24 = vector.load %arg10[%c0_22, %c0_23] : memref<128x128xf32, #tpu.memory_space<vmem>>, vector<128x128xf32>
    %cst_24 = arith.constant dense<0.000000e+00> : vector<64x128xf32>
    %25 = tpu.matmul %23, %24, %cst_24 {dimension_numbers = #tpu.dot_dimension_numbers<[1], [0], [0], [1], [0, 0, 1, 1], [], []>} : vector<64x128xf32>, vector<128x128xf32>, vector<64x128xf32> -> vector<64x128xf32>
    %cst_25 = arith.constant 1.000000e-24 : f32
    %26 = vector.broadcast %cst_25 : f32 to vector<64x128xf32>
    %27 = arith.maximumf %25, %26 : vector<64x128xf32>
    %28 = math.rsqrt %27 : vector<64x128xf32>
    %29 = arith.mulf %22, %28 : vector<64x128xf32>
    %c0_26 = arith.constant 0 : index
    %c0_27 = arith.constant 0 : index
    %30 = vector.load %arg4[%c0_26, %c0_27] : memref<1x128xf32, #tpu.memory_space<vmem>>, vector<1x128xf32>
    %31 = vector.broadcast %30 : vector<1x128xf32> to vector<64x128xf32>
    %32 = arith.mulf %29, %31 : vector<64x128xf32>
    %cst_28 = arith.constant 0.000000e+00 : f32
    %33 = vector.broadcast %cst_28 : f32 to vector<64x128xf32>
    %34 = arith.subf %33, %32 : vector<64x128xf32>
    %35 = math.exp %34 : vector<64x128xf32>
    %cst_29 = arith.constant 1.000000e+00 : f32
    %36 = vector.broadcast %cst_29 : f32 to vector<64x128xf32>
    %37 = arith.addf %36, %35 : vector<64x128xf32>
    %38 = arith.divf %32, %37 : vector<64x128xf32>
    %39 = vector.shape_cast %38 : vector<64x128xf32> to vector<8x8x128xf32>
    %cst_30 = arith.constant 0.000000e+00 : f32
    %40 = vector.broadcast %cst_30 : f32 to vector<1x8x128xf32>
    %41 = tpu.concatenate %40, %39, %40 in 0 : vector<1x8x128xf32>, vector<8x8x128xf32>, vector<1x8x128xf32> -> vector<10x8x128xf32>
    %42 = vector.extract_strided_slice %41 {offsets = [0, 0, 0], sizes = [8, 8, 128], strides = [1, 1, 1]} : vector<10x8x128xf32> to vector<8x8x128xf32>
    %43 = vector.shape_cast %42 : vector<8x8x128xf32> to vector<64x128xf32>
    %c0_31 = arith.constant 0 : index
    %c0_32 = arith.constant 0 : index
    %c0_33 = arith.constant 0 : index
    %44 = vector.load %arg5[%c0_31, %c0_32, %c0_33] : memref<3x128x128xf32, #tpu.memory_space<vmem>>, vector<1x128x128xf32>
    %45 = vector.shape_cast %44 : vector<1x128x128xf32> to vector<128x128xf32>
    %cst_34 = arith.constant dense<0.000000e+00> : vector<64x128xf32>
    %46 = tpu.matmul %43, %45, %cst_34 {dimension_numbers = #tpu.dot_dimension_numbers<[1], [0], [0], [1], [0, 0, 1, 1], [], []>} : vector<64x128xf32>, vector<128x128xf32>, vector<64x128xf32> -> vector<64x128xf32>
    %47 = vector.extract_strided_slice %41 {offsets = [1, 0, 0], sizes = [8, 8, 128], strides = [1, 1, 1]} : vector<10x8x128xf32> to vector<8x8x128xf32>
    %48 = vector.shape_cast %47 : vector<8x8x128xf32> to vector<64x128xf32>
    %c1_35 = arith.constant 1 : index
    %c0_36 = arith.constant 0 : index
    %c0_37 = arith.constant 0 : index
    %49 = vector.load %arg5[%c1_35, %c0_36, %c0_37] : memref<3x128x128xf32, #tpu.memory_space<vmem>>, vector<1x128x128xf32>
    %50 = vector.shape_cast %49 : vector<1x128x128xf32> to vector<128x128xf32>
    %cst_38 = arith.constant dense<0.000000e+00> : vector<64x128xf32>
    %51 = tpu.matmul %48, %50, %cst_38 {dimension_numbers = #tpu.dot_dimension_numbers<[1], [0], [0], [1], [0, 0, 1, 1], [], []>} : vector<64x128xf32>, vector<128x128xf32>, vector<64x128xf32> -> vector<64x128xf32>
    %52 = arith.addf %46, %51 : vector<64x128xf32>
    %53 = vector.extract_strided_slice %41 {offsets = [2, 0, 0], sizes = [8, 8, 128], strides = [1, 1, 1]} : vector<10x8x128xf32> to vector<8x8x128xf32>
    %54 = vector.shape_cast %53 : vector<8x8x128xf32> to vector<64x128xf32>
    %c2_39 = arith.constant 2 : index
    %c0_40 = arith.constant 0 : index
    %c0_41 = arith.constant 0 : index
    %55 = vector.load %arg5[%c2_39, %c0_40, %c0_41] : memref<3x128x128xf32, #tpu.memory_space<vmem>>, vector<1x128x128xf32>
    %56 = vector.shape_cast %55 : vector<1x128x128xf32> to vector<128x128xf32>
    %cst_42 = arith.constant dense<0.000000e+00> : vector<64x128xf32>
    %57 = tpu.matmul %54, %56, %cst_42 {dimension_numbers = #tpu.dot_dimension_numbers<[1], [0], [0], [1], [0, 0, 1, 1], [], []>} : vector<64x128xf32>, vector<128x128xf32>, vector<64x128xf32> -> vector<64x128xf32>
    %58 = arith.addf %52, %57 : vector<64x128xf32>
    %c0_43 = arith.constant 0 : index
    %c0_44 = arith.constant 0 : index
    %59 = vector.load %arg6[%c0_43, %c0_44] : memref<1x128xf32, #tpu.memory_space<vmem>>, vector<1x128xf32>
    %60 = vector.broadcast %59 : vector<1x128xf32> to vector<64x128xf32>
    %61 = arith.addf %58, %60 : vector<64x128xf32>
    %62 = arith.mulf %61, %61 : vector<64x128xf32>
    %c0_45 = arith.constant 0 : index
    %c0_46 = arith.constant 0 : index
    %63 = vector.load %arg10[%c0_45, %c0_46] : memref<128x128xf32, #tpu.memory_space<vmem>>, vector<128x128xf32>
    %cst_47 = arith.constant dense<0.000000e+00> : vector<64x128xf32>
    %64 = tpu.matmul %62, %63, %cst_47 {dimension_numbers = #tpu.dot_dimension_numbers<[1], [0], [0], [1], [0, 0, 1, 1], [], []>} : vector<64x128xf32>, vector<128x128xf32>, vector<64x128xf32> -> vector<64x128xf32>
    %cst_48 = arith.constant 1.000000e-24 : f32
    %65 = vector.broadcast %cst_48 : f32 to vector<64x128xf32>
    %66 = arith.maximumf %64, %65 : vector<64x128xf32>
    %67 = math.rsqrt %66 : vector<64x128xf32>
    %68 = arith.mulf %61, %67 : vector<64x128xf32>
    %c0_49 = arith.constant 0 : index
    %c0_50 = arith.constant 0 : index
    %69 = vector.load %arg7[%c0_49, %c0_50] : memref<1x128xf32, #tpu.memory_space<vmem>>, vector<1x128xf32>
    %70 = vector.broadcast %69 : vector<1x128xf32> to vector<64x128xf32>
    %71 = arith.mulf %68, %70 : vector<64x128xf32>
    %cst_51 = arith.constant 0.000000e+00 : f32
    %72 = vector.broadcast %cst_51 : f32 to vector<64x128xf32>
    %73 = arith.subf %72, %71 : vector<64x128xf32>
    %74 = math.exp %73 : vector<64x128xf32>
    %cst_52 = arith.constant 1.000000e+00 : f32
    %75 = vector.broadcast %cst_52 : f32 to vector<64x128xf32>
    %76 = arith.addf %75, %74 : vector<64x128xf32>
    %77 = arith.divf %71, %76 : vector<64x128xf32>
    %c0_53 = arith.constant 0 : index
    %c0_54 = arith.constant 0 : index
    %78 = vector.load %arg8[%c0_53, %c0_54] : memref<128x128xf32, #tpu.memory_space<vmem>>, vector<128x128xf32>
    %cst_55 = arith.constant dense<0.000000e+00> : vector<64x128xf32>
    %79 = tpu.matmul %77, %78, %cst_55 {dimension_numbers = #tpu.dot_dimension_numbers<[1], [0], [0], [1], [0, 0, 1, 1], [], []>} : vector<64x128xf32>, vector<128x128xf32>, vector<64x128xf32> -> vector<64x128xf32>
    %c0_56 = arith.constant 0 : index
    %c0_57 = arith.constant 0 : index
    %80 = vector.load %arg9[%c0_56, %c0_57] : memref<1x128xf32, #tpu.memory_space<vmem>>, vector<1x128xf32>
    %81 = vector.broadcast %80 : vector<1x128xf32> to vector<64x128xf32>
    %82 = arith.addf %79, %81 : vector<64x128xf32>
    %c0_58 = arith.constant 0 : index
    %c0_59 = arith.constant 0 : index
    %c1_60 = arith.constant 1 : index
    %c16 = arith.constant 16 : index
    %83 = vector.load %arg1[%c0_58, %c0_59, %c1_60, %c16] : memref<1x8x10x160xf32, #tpu.memory_space<vmem>>, vector<1x8x8x128xf32>
    %84 = vector.shape_cast %83 : vector<1x8x8x128xf32> to vector<8x8x128xf32>
    %85 = vector.shape_cast %82 : vector<64x128xf32> to vector<8x8x128xf32>
    %86 = arith.addf %85, %84 : vector<8x8x128xf32>
    %c0_61 = arith.constant 0 : index
    %c0_62 = arith.constant 0 : index
    %c0_63 = arith.constant 0 : index
    %c0_64 = arith.constant 0 : index
    %87 = vector.load %arg11[%c0_61, %c0_62, %c0_63, %c0_64] : memref<1x8x8x128xf32, #tpu.memory_space<vmem>>, vector<1x8x8x128xf32>
    %88 = vector.shape_cast %87 : vector<1x8x8x128xf32> to vector<8x8x128xf32>
    %89 = vector.shape_cast %86 : vector<8x8x128xf32> to vector<1x8x8x128xf32>
    tpu.vector_store %arg11[%c0_61, %c0_62, %c0_63, %c0_64], %89 {strides = array<i32>} : memref<1x8x8x128xf32, #tpu.memory_space<vmem>>, vector<1x8x8x128xf32>,
    return
  }
  func.func @transform_0(%arg0: i32) -> (i32, i32, i32, i32) {
    %c0_i32 = arith.constant 0 : i32
    %c0_i32_0 = arith.constant 0 : i32
    %c0_i32_1 = arith.constant 0 : i32
    %c0_i32_2 = arith.constant 0 : i32
    return %arg0, %c0_i32, %c0_i32_0, %c0_i32_1 : i32, i32, i32, i32
  }
  func.func @transform_1(%arg0: i32) -> (i32, i32, i32) {
    %c0_i32 = arith.constant 0 : i32
    %c0_i32_0 = arith.constant 0 : i32
    %c0_i32_1 = arith.constant 0 : i32
    %c0_i32_2 = arith.constant 0 : i32
    return %c0_i32, %c0_i32_0, %c0_i32_1 : i32, i32, i32
  }
  func.func @transform_2(%arg0: i32) -> (i32, i32) {
    %c0_i32 = arith.constant 0 : i32
    %c0_i32_0 = arith.constant 0 : i32
    %c0_i32_1 = arith.constant 0 : i32
    return %c0_i32, %c0_i32_0 : i32, i32
  }
  func.func @transform_3(%arg0: i32) -> (i32, i32) {
    %c0_i32 = arith.constant 0 : i32
    %c0_i32_0 = arith.constant 0 : i32
    %c0_i32_1 = arith.constant 0 : i32
    return %c0_i32, %c0_i32_0 : i32, i32
  }
  func.func @transform_4(%arg0: i32) -> (i32, i32, i32) {
    %c0_i32 = arith.constant 0 : i32
    %c0_i32_0 = arith.constant 0 : i32
    %c0_i32_1 = arith.constant 0 : i32
    %c0_i32_2 = arith.constant 0 : i32
    return %c0_i32, %c0_i32_0, %c0_i32_1 : i32, i32, i32
  }
  func.func @transform_5(%arg0: i32) -> (i32, i32) {
    %c0_i32 = arith.constant 0 : i32
    %c0_i32_0 = arith.constant 0 : i32
    %c0_i32_1 = arith.constant 0 : i32
    return %c0_i32, %c0_i32_0 : i32, i32
  }
  func.func @transform_6(%arg0: i32) -> (i32, i32) {
    %c0_i32 = arith.constant 0 : i32
    %c0_i32_0 = arith.constant 0 : i32
    %c0_i32_1 = arith.constant 0 : i32
    return %c0_i32, %c0_i32_0 : i32, i32
  }
  func.func @transform_7(%arg0: i32) -> (i32, i32) {
    %c0_i32 = arith.constant 0 : i32
    %c0_i32_0 = arith.constant 0 : i32
    %c0_i32_1 = arith.constant 0 : i32
    return %c0_i32, %c0_i32_0 : i32, i32
  }
  func.func @transform_8(%arg0: i32) -> (i32, i32) {
    %c0_i32 = arith.constant 0 : i32
    %c0_i32_0 = arith.constant 0 : i32
    %c0_i32_1 = arith.constant 0 : i32
    return %c0_i32, %c0_i32_0 : i32, i32
  }
  func.func @transform_9(%arg0: i32) -> (i32, i32) {
    %c0_i32 = arith.constant 0 : i32
    %c0_i32_0 = arith.constant 0 : i32
    %c0_i32_1 = arith.constant 0 : i32
    return %c0_i32, %c0_i32_0 : i32, i32
  }
  func.func @transform_10(%arg0: i32) -> (i32, i32, i32, i32) {
    %c0_i32 = arith.constant 0 : i32
    %c0_i32_0 = arith.constant 0 : i32
    %c0_i32_1 = arith.constant 0 : i32
    %c0_i32_2 = arith.constant 0 : i32
    return %arg0, %c0_i32, %c0_i32_0, %c0_i32_1 : i32, i32, i32, i32
  }
}

</mosaic_0001>

<bundles_post_ra>
// kernel: tile.28
= control target key start
LH: loop header
LB: loop body
LE: loop exit
PB: predicated region body
PF: predicated region fallthrough
CT: control target
= control target key end

     0   :  { %s22_s0 = inlined_call_operand.vmem [shape: f32[16], index: 0, kind: input, shape index: {}]   ;;  %s23_s1 = inlined_call_operand.vmem [shape: f32[8,16], index: 1, kind: output, shape index: {}]  }
   0x1   :  { %v4_v0 = vld [vmem:[%s22_s0] ss:$0 sm:$0xff] }
   0x2   :  { %5 = vst [vmem:[%s23_s1] sm:$0xff] %v4_v0 }

// kernel: tile.29
= control target key start
LH: loop header
LB: loop body
LE: loop exit
PB: predicated region body
PF: predicated region fallthrough
CT: control target
= control target key end

     0   :  { %s67_s10 = smov 112   ;;  %s68_s11 = smov 80   ;;  %vm3_vm0 = vcmask 130048   ;;  %vm9_vm1 = vcmask 1048448   ;;  %vm15_vm2 = vcmask 917248   ;;  %vm21_vm3 = vcmask 786048   ;;  %s111_s0 = inlined_call_operand.vmem [shape: f32[8,16], index: 0, kind: input, shape index: {}]   ;;  %s112_s1 = inlined_call_operand.vmem [shape: f32[1,128], index: 1, kind: output, shape index: {}]  }
   0x1   :  { %v53_v0 = vld [vmem:[%s111_s0 + $0x7] sm:$0x1]   ;;  %v55_v1 = vld [vmem:[%s111_s0 + $0x5] sm:$0x1]   ;;  %v57_v2 = vld [vmem:[%s111_s0 + $0x3] sm:$0x1]  }
   0x2   :  { %7 = vrot.lane.b32.xlu0 %v53_v0, %s67_s10  ;;  %19 = vrot.lane.b32.xlu1 %v55_v1, %s68_s11  ;;  %s69_s14 = smov 48   ;;  %v54_v3 = vld [vmem:[%s111_s0 + $0x6] sm:$0x1]   ;;  %v56_v4 = vld [vmem:[%s111_s0 + $0x4] sm:$0x1]   ;;  %s70_s21 = smov 96  }
   0x3   :  { %31 = vrot.lane.b32.xlu2 %v57_v2, %s69_s14  ;;  %v58_v5 = vld [vmem:[%s111_s0 + $0x2] sm:$0x1]   ;;  %s71_s22 = smov 64   ;;  %s72_s23 = smov 32   ;;  %v59_v6 = vld [vmem:[%s111_s0 + $0x1] sm:$0x1]  }
   0x4   :  { %s73_s26 = smov 16   ;;  %v2_v7 = vld [vmem:[%s111_s0] sm:$0x1]   ;;  %vm27_vm4 = vcmask 654848   ;;  %vm33_vm5 = vcmask 523648   ;;  %vm39_vm6 = vcmask 392448  }
   0x5   :  { %4 = vst.msk [vmem:[#allocation0] sm:$0x1] %vm3_vm0, %v2_v7   ;;  %vm45_vm7 = vcmask 261248  }
   0xa   :  { %13 = vrot.lane.b32.xlu0 %v54_v3, %s70_s21  ;;  %25 = vrot.lane.b32.xlu1 %v56_v4, %s71_s22 }
   0xb   :  { %37 = vrot.lane.b32.xlu2 %v58_v5, %s72_s23 }
  0x12   :  { %43 = vrot.lane.b32.xlu0 %v59_v6, %s73_s26 }
  0x5d   :  { %v32_v8 = vpop.permute.xlu2 %31  }
  0x65   :  { %v38_v9 = vpop.permute.xlu2 %37  }
  0x74   :  { %v8_v10 = vpop.permute.xlu0 %7   ;;  %v20_v11 = vpop.permute.xlu1 %19  }
  0x75   :  { %10 = vst.msk [vmem:[#allocation0] sm:$0x1] %vm9_vm1, %v8_v10  }
  0x7c   :  { %v14_v12 = vpop.permute.xlu0 %13   ;;  %v26_v13 = vpop.permute.xlu1 %25  }
  0x7d   :  { %16 = vst.msk [vmem:[#allocation0] sm:$0x1] %vm15_vm2, %v14_v12  }
  0x7e   :  { %22 = vst.msk [vmem:[#allocation0] sm:$0x1] %vm21_vm3, %v20_v11  }
  0x7f   :  { %28 = vst.msk [vmem:[#allocation0] sm:$0x1] %vm27_vm4, %v26_v13  }
  0x80   :  { %34 = vst.msk [vmem:[#allocation0] sm:$0x1] %vm33_vm5, %v32_v8  }
  0x81   :  { %40 = vst.msk [vmem:[#allocation0] sm:$0x1] %vm39_vm6, %v38_v9  }
  0x84   :  { %v44_v14 = vpop.permute.xlu0 %43  }
  0x85   :  { %46 = vst.msk [vmem:[#allocation0] sm:$0x1] %vm45_vm7, %v44_v14  }
  0x8c   :  { %v49_v15 = vld [vmem:[#allocation0] sm:$0x1] }
  0x8d   :  { %52 = vst [vmem:[%s112_s1] sm:$0x1] %v49_v15 }

// kernel: mul.1
= control target key start
LH: loop header
LB: loop body
LE: loop exit
PB: predicated region body
PF: predicated region fallthrough
CT: control target
= control target key end

     0   :  { %s364_s0 = inlined_call_operand.vmem [shape: f32[128,128], index: 0, kind: input, shape index: {}]   ;;  %s365_s1 = inlined_call_operand.vmem [shape: f32[128,128], index: 1, kind: input, shape index: {}]   ;;  %s366_s2 = inlined_call_operand.vmem [shape: f32[128,128], index: 2, kind: output, shape index: {}]  }
   0x1   :  { %v3_v0 = vld [vmem:[%s364_s0] sm:$0xff]  ;;  %v160_v2 = vld [vmem:[%s364_s0 + $0x8] sm:$0xff]  ;;  %v163_v5 = vld [vmem:[%s364_s0 + $0x10] sm:$0xff] }
   0x2   :  { %v4_v1 = vld [vmem:[%s365_s1] sm:$0xff]  ;;  %v161_v4 = vld [vmem:[%s365_s1 + $0x8] sm:$0xff]  ;;  %v164_v6 = vld [vmem:[%s365_s1 + $0x10] sm:$0xff] }
   0x3   :  { %v7_v3 = vmul.f32 %v4_v1, %v3_v0  ;;  %v16_v7 = vmul.f32 %v161_v4, %v160_v2  ;;  %v26_v8 = vmul.f32 %v164_v6, %v163_v5  ;;  %v166_v9 = vld [vmem:[%s364_s0 + $0x18] sm:$0xff]  ;;  %v169_v11 = vld [vmem:[%s364_s0 + $0x20] sm:$0xff]  ;;  %v172_v14 = vld [vmem:[%s364_s0 + $0x28] sm:$0xff] }
   0x4   :  { %v167_v10 = vld [vmem:[%s365_s1 + $0x18] sm:$0xff]  ;;  %v170_v13 = vld [vmem:[%s365_s1 + $0x20] sm:$0xff]  ;;  %v173_v15 = vld [vmem:[%s365_s1 + $0x28] sm:$0xff] }
   0x5   :  { %9 = vst [vmem:[%s366_s2] sm:$0xff] %v7_v3  ;;  %v36_v12 = vmul.f32 %v167_v10, %v166_v9  ;;  %v46_v16 = vmul.f32 %v170_v13, %v169_v11  ;;  %v56_v17 = vmul.f32 %v173_v15, %v172_v14  ;;  %v175_v18 = vld [vmem:[%s364_s0 + $0x30] sm:$0xff]  ;;  %v178_v20 = vld [vmem:[%s364_s0 + $0x38] sm:$0xff]  ;;  %v181_v23 = vld [vmem:[%s364_s0 + $0x40] sm:$0xff] }
   0x6   :  { %162 = vst [vmem:[%s366_s2 + $0x8] sm:$0xff] %v16_v7  ;;  %v176_v19 = vld [vmem:[%s365_s1 + $0x30] sm:$0xff]  ;;  %v179_v22 = vld [vmem:[%s365_s1 + $0x38] sm:$0xff]  ;;  %v182_v24 = vld [vmem:[%s365_s1 + $0x40] sm:$0xff] }
   0x7   :  { %165 = vst [vmem:[%s366_s2 + $0x10] sm:$0xff] %v26_v8  ;;  %v66_v21 = vmul.f32 %v176_v19, %v175_v18  ;;  %v76_v25 = vmul.f32 %v179_v22, %v178_v20  ;;  %v86_v26 = vmul.f32 %v182_v24, %v181_v23  ;;  %v184_v27 = vld [vmem:[%s364_s0 + $0x48] sm:$0xff]  ;;  %v187_v29 = vld [vmem:[%s364_s0 + $0x50] sm:$0xff]  ;;  %v190_v32 = vld [vmem:[%s364_s0 + $0x58] sm:$0xff] }
   0x8   :  { %168 = vst [vmem:[%s366_s2 + $0x18] sm:$0xff] %v36_v12  ;;  %v185_v28 = vld [vmem:[%s365_s1 + $0x48] sm:$0xff]  ;;  %v188_v31 = vld [vmem:[%s365_s1 + $0x50] sm:$0xff]  ;;  %v191_v33 = vld [vmem:[%s365_s1 + $0x58] sm:$0xff] }
   0x9   :  { %171 = vst [vmem:[%s366_s2 + $0x20] sm:$0xff] %v46_v16  ;;  %v96_v30 = vmul.f32 %v185_v28, %v184_v27  ;;  %v106_v34 = vmul.f32 %v188_v31, %v187_v29  ;;  %v116_v35 = vmul.f32 %v191_v33, %v190_v32  ;;  %v193_v36 = vld [vmem:[%s364_s0 + $0x60] sm:$0xff]  ;;  %v196_v38 = vld [vmem:[%s364_s0 + $0x68] sm:$0xff]  ;;  %v199_v41 = vld [vmem:[%s364_s0 + $0x70] sm:$0xff] }
   0xa   :  { %174 = vst [vmem:[%s366_s2 + $0x28] sm:$0xff] %v56_v17  ;;  %v194_v37 = vld [vmem:[%s365_s1 + $0x60] sm:$0xff]  ;;  %v197_v40 = vld [vmem:[%s365_s1 + $0x68] sm:$0xff]  ;;  %v200_v42 = vld [vmem:[%s365_s1 + $0x70] sm:$0xff] }
   0xb   :  { %177 = vst [vmem:[%s366_s2 + $0x30] sm:$0xff] %v66_v21  ;;  %v126_v39 = vmul.f32 %v194_v37, %v193_v36  ;;  %v136_v43 = vmul.f32 %v197_v40, %v196_v38  ;;  %v146_v44 = vmul.f32 %v200_v42, %v199_v41  ;;  %v202_v45 = vld [vmem:[%s364_s0 + $0x78] sm:$0xff] }
   0xc   :  { %180 = vst [vmem:[%s366_s2 + $0x38] sm:$0xff] %v76_v25  ;;  %v203_v46 = vld [vmem:[%s365_s1 + $0x78] sm:$0xff] }
   0xd   :  { %183 = vst [vmem:[%s366_s2 + $0x40] sm:$0xff] %v86_v26  ;;  %v156_v47 = vmul.f32 %v203_v46, %v202_v45 }
   0xe   :  { %186 = vst [vmem:[%s366_s2 + $0x48] sm:$0xff] %v96_v30 }
   0xf   :  { %189 = vst [vmem:[%s366_s2 + $0x50] sm:$0xff] %v106_v34 }
  0x10   :  { %192 = vst [vmem:[%s366_s2 + $0x58] sm:$0xff] %v116_v35 }
  0x11   :  { %195 = vst [vmem:[%s366_s2 + $0x60] sm:$0xff] %v126_v39 }
  0x12   :  { %198 = vst [vmem:[%s366_s2 + $0x68] sm:$0xff] %v136_v43 }
  0x13   :  { %201 = vst [vmem:[%s366_s2 + $0x70] sm:$0xff] %v146_v44 }
  0x14   :  { %204 = vst [vmem:[%s366_s2 + $0x78] sm:$0xff] %v156_v47 }

// kernel: conv_inflation_block.1
= control target key start
LH: loop header
LB: loop body
LE: loop exit
PB: predicated region body
PF: predicated region fallthrough
CT: control target
= control target key end

     0   :  { %s2328_s13 = smov 0   ;;  %s3398_s0 = inlined_call_operand.vmem [shape: f32[2,8,10,160], index: 0, kind: input, shape index: {}]   ;;  %s3399_s1 = inlined_call_operand.vmem [shape: f32[3,160,128], index: 1, kind: input, shape index: {}]   ;;  %s3400_s2 = inlined_call_operand.vmem [shape: f32[1,128], index: 2, kind: input, shape index: {}]   ;;  %s3401_s3 = inlined_call_operand.vmem [shape: f32[1,128], index: 3, kind: input, shape index: {}]   ;;  %s3402_s4 = inlined_call_operand.vmem [shape: f32[3,128,128], index: 4, kind: input, shape index: {}]   ;;  %s3403_s5 = inlined_call_operand.vmem [shape: f32[1,128], index: 5, kind: input, shape index: {}]   ;;  %s3404_s6 = inlined_call_operand.vmem [shape: f32[1,128], index: 6, kind: input, shape index: {}]   ;;  %s3405_s7 = inlined_call_operand.vmem [shape: f32[128,128], index: 7, kind: input, shape index: {}]   ;;  %s3406_s8 = inlined_call_operand.vmem [shape: f32[1,128], index: 8, kind: input, shape index: {}]   ;;  %s3407_s9 = inlined_call_operand.vmem [shape: f32[128,128], index: 9, kind: input, shape index: {}]   ;;  %s3408_s10 = inlined_call_operand.vmem [shape: f32[2,8,8,128], index: 10, kind: output, shape index: {}]  }
   0x1 LB: > { %s2011_s14 = sadd.s32 4294967295, %s2269_s13   ;;  %p2015_p0 = scmp.ge.s32.totalorder %s2269_s13, 1  ;;  %s2269_s13 = sphi %s2328_s13, %s20_s13  }
   0x2   : > { %p312_p1 = scmp.lt.s32.totalorder %s2269_s13, 3 }
   0x4   : > { %p313_p2 = pnand %p2015_p0, %p312_p1 }
   0x6   : > { %316 = sbr.rel (%p313_p2) target bundleno = 931 (0x3a3), region = 60 }
   0xb   : > { %v2035_v0 = vld [vmem:[%s3399_s1 + $0x118] sm:$0xff]  ;;  %p350_p3 = scmp.lt.s32.totalorder %s2011_s14, 1  ;;  %v2034_v3 = vld [vmem:[%s3399_s1 + $0x110] sm:$0xff]  ;;  %v2033_v6 = vld [vmem:[%s3399_s1 + $0x108] sm:$0xff]  ;;  %vm538_vm0 = vcmask 261120   ;;  %vm460_vm1 = vcmask 1046528  }
   0xc   : > { %v391_v1 = vld [vmem:[%s3399_s1 + $0x78] sm:$0xff]  ;;  %555 = vmatpush.msra.mxu0 %v2035_v0  ;;  %v390_v4 = vld [vmem:[%s3399_s1 + $0x70] sm:$0xff]  ;;  %v389_v7 = vld [vmem:[%s3399_s1 + $0x68] sm:$0xff]  ;;  %vm807_vm2 = vcmask 1045504  }
   0xd   : > { %v395_v2 = vld [vmem:[%s3399_s1 + $0x98] sm:$0xff]  ;;  %661 = vmatpush.msra.mxu2 %v391_v1  ;;  %v394_v5 = vld [vmem:[%s3399_s1 + $0x90] sm:$0xff]  ;;  %s3418_s14 = smov (!%p350_p3, %s2011_s14), 1  ;;  %v393_v8 = vld [vmem:[%s3399_s1 + $0x88] sm:$0xff] }
   0xe   : > { %714 = vmatpush.msra.mxu3 %v395_v2  ;;  %556 = vmatpush.msra.mxu0 %v2034_v3  ;;  %v2039_v9 = vld [vmem:[%s3399_s1 + $0x138] sm:$0xff]  ;;  %v2032_v10 = vld [vmem:[%s3399_s1 + $0x100] sm:$0xff]  ;;  %s2118_s21 = sshll.u32 %s3418_s14, 8  ;;  %v2038_v13 = vld [vmem:[%s3399_s1 + $0x130] sm:$0xff]  ;;  %s2119_s27 = sshll.u32 %s3418_s14, 6 }
   0xf   : > { %662 = vmatpush.msra.mxu2 %v390_v4  ;;  %608 = vmatpush.msra.mxu1 %v2039_v9  ;;  %v388_v11 = vld [vmem:[%s3399_s1 + $0x60] sm:$0xff]  ;;  %s2381_s26 = scalar_lea.vmem %s3398_s0, %s2118_s21  ;;  %v2031_v15 = vld [vmem:[%s3399_s1 + $0xf8] sm:$0xff]  ;;  %v2037_v16 = vld [vmem:[%s3399_s1 + $0x128] sm:$0xff]  ;;  %s3378_s30 = scalar_lea.vmem %s3408_s10, %s2119_s27 }
  0x10   : > { %715 = vmatpush.msra.mxu3 %v394_v5  ;;  %557 = vmatpush.msra.mxu0 %v2033_v6  ;;  %v392_v12 = vld [vmem:[%s3399_s1 + $0x80] sm:$0xff]  ;;  %v361_v14 = vld [vmem:[%s2381_s26 + $0x8] sm:$0xff]  ;;  %v2075_v17 = vld [vmem:[%s3399_s1 + $0x1d8] sm:$0xff] }
  0x11   : > { %663 = vmatpush.msra.mxu2 %v389_v7  ;;  %609 = vmatpush.msra.mxu1 %v2038_v13  ;;  %v387_v18 = vld [vmem:[%s3399_s1 + $0x58] sm:$0xff]  ;;  %v2030_v19 = vld [vmem:[%s3399_s1 + $0xf0] sm:$0xff]  ;;  %v2036_v20 = vld [vmem:[%s3399_s1 + $0x120] sm:$0xff] }
  0x12   : > { %716 = vmatpush.msra.mxu3 %v393_v8  ;;  %558 = vmatpush.msra.mxu0 %v2032_v10  ;;  %v397_v21 = vld [vmem:[%s2381_s26 + $0x8] sm:$0xfe]  ;;  %v399_v22 = vld [vmem:[%s2381_s26 + $0x18] sm:$0x1]  ;;  %v386_v23 = vld [vmem:[%s3399_s1 + $0x50] sm:$0xff] }
  0x13   : > { %664 = vmatpush.msra.mxu2 %v388_v11  ;;  %610 = vmatpush.msra.mxu1 %v2037_v16  ;;  %v464_v24 = vrot.slane %v397_v21, 1  ;;  %v465_v25 = vrot.slane %v399_v22, 1  ;;  %v2029_v26 = vld [vmem:[%s3399_s1 + $0xe8] sm:$0xff]  ;;  %v2071_v27 = vld [vmem:[%s3399_s1 + $0x1b8] sm:$0xff]  ;;  %v2028_v30 = vld [vmem:[%s3399_s1 + $0xe0] sm:$0xff] }
  0x14   : > { %717 = vmatpush.msra.mxu3 %v392_v12  ;;  %559 = vmatpush.msra.mxu0 %v2031_v15  ;;  %v385_v28 = vld [vmem:[%s3399_s1 + $0x48] sm:$0xff]  ;;  %v2070_v31 = vld [vmem:[%s3399_s1 + $0x1b0] sm:$0xff]  ;;  %v403_v33 = vld [vmem:[%s2381_s26 + $0x38] sm:$0x1] }
  0x15   : > { %2048 = vmatmul.msk.f32.vlgmr.msra.gmra.mxu3 %vm538_vm0, %v361_v14  ;;  %665 = vmatpush.msra.mxu2 %v387_v18  ;;  %v2421_v29 = vsel %vm460_vm1, %v464_v24, %v465_v25  ;;  %v401_v32 = vld [vmem:[%s2381_s26 + $0x28] sm:$0xfe]  ;;  %v384_v34 = vld [vmem:[%s3399_s1 + $0x40] sm:$0xff]  ;;  %v471_v36 = vrot.slane %v403_v33, 1  ;;  %v2027_v38 = vld [vmem:[%s3399_s1 + $0xd8] sm:$0xff] }
  0x16   : > { %954 = vmatpush.msrb.mxu3 %v2075_v17  ;;  %560 = vmatpush.msra.mxu0 %v2030_v19  ;;  %v470_v35 = vrot.slane %v401_v32, 1  ;;  %v363_v37 = vld [vmem:[%s2381_s26 + $0x28] sm:$0xff]  ;;  %v2074_v39 = vld [vmem:[%s3399_s1 + $0x1d0] sm:$0xff]  ;;  %v383_v40 = vld [vmem:[%s3399_s1 + $0x38] sm:$0xff] }
  0x17   : > { %611 = vmatpush.msra.mxu1 %v2036_v20  ;;  %666 = vmatpush.msra.mxu2 %v386_v23  ;;  %v2069_v41 = vld [vmem:[%s3399_s1 + $0x1a8] sm:$0xff]  ;;  %v2026_v42 = vld [vmem:[%s3399_s1 + $0xd0] sm:$0xff]  ;;  %v2068_v46 = vld [vmem:[%s3399_s1 + $0x1a0] sm:$0xff] }
  0x18   : > { %2040 = vmatmul.msk.f32.vlgmr.msra.gmra.mxu1 %vm538_vm0, %v2421_v29  ;;  %561 = vmatpush.msra.mxu0 %v2029_v26  ;;  %v382_v43 = vld [vmem:[%s3399_s1 + $0x30] sm:$0xff]  ;;  %v2025_v44 = vld [vmem:[%s3399_s1 + $0xc8] sm:$0xff]  ;;  %v2460_v45 = vsel %vm460_vm1, %v470_v35, %v471_v36  ;;  %v407_v48 = vld [vmem:[%s2381_s26 + $0x58] sm:$0x1] }
  0x19   : > { %901 = vmatpush.msrb.mxu1 %v2071_v27  ;;  %667 = vmatpush.msra.mxu2 %v385_v28  ;;  %v405_v47 = vld [vmem:[%s2381_s26 + $0x48] sm:$0xfe]  ;;  %v2024_v50 = vld [vmem:[%s3399_s1 + $0xc0] sm:$0xff]  ;;  %v2067_v51 = vld [vmem:[%s3399_s1 + $0x198] sm:$0xff]  ;;  %v477_v56 = vrot.slane %v407_v48, 1 }
  0x1a   : > { %562 = vmatpush.msra.mxu0 %v2028_v30  ;;  %955 = vmatpush.msrb.mxu3 %v2074_v39  ;;  %v381_v49 = vld [vmem:[%s3399_s1 + $0x28] sm:$0xff]  ;;  %v380_v52 = vld [vmem:[%s3399_s1 + $0x20] sm:$0xff]  ;;  %v2023_v54 = vld [vmem:[%s3399_s1 + $0xb8] sm:$0xff]  ;;  %v476_v55 = vrot.slane %v405_v47, 1 }
  0x1b   : > { %902 = vmatpush.msrb.mxu1 %v2070_v31  ;;  %668 = vmatpush.msra.mxu2 %v384_v34  ;;  %v365_v53 = vld [vmem:[%s2381_s26 + $0x48] sm:$0xff]  ;;  %v396_v57 = vld [vmem:[%s2381_s26] sm:$0xfe]  ;;  %v398_v58 = vld [vmem:[%s2381_s26 + $0x10] sm:$0x1] }
  0x1c   : > { %563 = vmatpush.msra.mxu0 %v2027_v38  ;;  %v2073_v59 = vld [vmem:[%s3399_s1 + $0x1c8] sm:$0xff]  ;;  %v379_v60 = vld [vmem:[%s3399_s1 + $0x18] sm:$0xff]  ;;  %v2066_v61 = vld [vmem:[%s3399_s1 + $0x190] sm:$0xff]  ;;  %v2507_v1 = vsel %vm460_vm1, %v476_v55, %v477_v56  ;;  %v461_v2 = vrot.slane %v396_v57, 1  ;;  %v462_v3 = vrot.slane %v398_v58, 1 }
  0x1d   : > { %2049 = vmatmul.msk.f32.gmra.mxu3 %vm538_vm0, %v363_v37  ;;  %669 = vmatpush.msra.mxu2 %v383_v40  ;;  %v2022_v62 = vld [vmem:[%s3399_s1 + $0xb0] sm:$0xff]  ;;  %v2021_v0 = vld [vmem:[%s3399_s1 + $0xa8] sm:$0xff]  ;;  %v411_v5 = vld [vmem:[%s2381_s26 + $0x78] sm:$0x1] }
  0x1e   : > { %903 = vmatpush.msrb.mxu1 %v2069_v41  ;;  %564 = vmatpush.msra.mxu0 %v2026_v42  ;;  %v378_v63 = vld [vmem:[%s3399_s1 + $0x10] sm:$0xff]  ;;  %v409_v4 = vld [vmem:[%s2381_s26 + $0x68] sm:$0xfe]  ;;  %v2020_v8 = vld [vmem:[%s3399_s1 + $0xa0] sm:$0xff]  ;;  %v2532_v12 = vsel %vm460_vm1, %v461_v2, %v462_v3  ;;  %v483_v15 = vrot.slane %v411_v5, 1 }
  0x1f   : > { %670 = vmatpush.msra.mxu2 %v382_v43  ;;  %956 = vmatpush.msrb.mxu3 %v2073_v59  ;;  %v2065_v6 = vld [vmem:[%s3399_s1 + $0x188] sm:$0xff]  ;;  %v2064_v9 = vld [vmem:[%s3399_s1 + $0x180] sm:$0xff]  ;;  %v482_v14 = vrot.slane %v409_v4, 1  ;;  %v402_v18 = vld [vmem:[%s2381_s26 + $0x30] sm:$0x1] }
  0x20   : > { %2041 = vmatmul.msk.f32.gmra.mxu1 %vm538_vm0, %v2460_v45  ;;  %565 = vmatpush.msra.mxu0 %v2025_v44  ;;  %v377_v7 = vld [vmem:[%s3399_s1 + $0x8] sm:$0xff]  ;;  %v2072_v10 = vld [vmem:[%s3399_s1 + $0x1c0] sm:$0xff]  ;;  %v2063_v19 = vld [vmem:[%s3399_s1 + $0x178] sm:$0xff]  ;;  %v468_v22 = vrot.slane %v402_v18, 1 }
  0x21   : > { %904 = vmatpush.msrb.mxu1 %v2068_v46  ;;  %671 = vmatpush.msra.mxu2 %v381_v49  ;;  %v376_v11 = vld [vmem:[%s3399_s1] sm:$0xff]  ;;  %v367_v16 = vld [vmem:[%s2381_s26 + $0x68] sm:$0xff]  ;;  %v2544_v20 = vsel %vm460_vm1, %v482_v14, %v483_v15  ;;  %v415_v24 = vld [vmem:[%s2381_s26 + $0x98] sm:$0x1] }
  0x22   : > { %566 = vmatpush.msra.mxu0 %v2024_v50  ;;  %v360_v13 = vld [vmem:[%s2381_s26] sm:$0xff]  ;;  %957 = vmatpush.msrb.mxu3 %v2072_v10  ;;  %v413_v23 = vld [vmem:[%s2381_s26 + $0x88] sm:$0xfe]  ;;  %v2062_v25 = vld [vmem:[%s3399_s1 + $0x170] sm:$0xff]  ;;  %v489_v31 = vrot.slane %v415_v24, 1 }
  0x23   : > { %905 = vmatpush.msrb.mxu1 %v2067_v51  ;;  %672 = vmatpush.msra.mxu2 %v380_v52  ;;  %v400_v17 = vld [vmem:[%s2381_s26 + $0x20] sm:$0xfe]  ;;  %v2061_v26 = vld [vmem:[%s3399_s1 + $0x168] sm:$0xff]  ;;  %v488_v30 = vrot.slane %v413_v23, 1  ;;  %v406_v34 = vld [vmem:[%s2381_s26 + $0x50] sm:$0x1] }
  0x24   : > { %567 = vmatpush.msra.mxu0 %v2023_v54  ;;  %v467_v21 = vrot.slane %v400_v17, 1  ;;  %v362_v28 = vld [vmem:[%s2381_s26 + $0x20] sm:$0xff]  ;;  %v369_v32 = vld [vmem:[%s2381_s26 + $0x88] sm:$0xff]  ;;  %v474_v38 = vrot.slane %v406_v34, 1  ;;  %v419_v40 = vld [vmem:[%s2381_s26 + $0xb8] sm:$0x1] }
  0x25   : > { %2050 = vmatmul.msk.f32.gmra.mxu3 %vm538_vm0, %v365_v53  ;;  %673 = vmatpush.msra.mxu2 %v379_v60  ;;  %v404_v33 = vld [vmem:[%s2381_s26 + $0x40] sm:$0xfe]  ;;  %v2569_v36 = vsel %vm460_vm1, %v488_v30, %v489_v31  ;;  %v417_v39 = vld [vmem:[%s2381_s26 + $0xa8] sm:$0xfe]  ;;  %v2059_v41 = vld [vmem:[%s3399_s1 + $0x158] sm:$0xff]  ;;  %v495_v47 = vrot.slane %v419_v40, 1 }
  0x26   : > { %906 = vmatpush.msrb.mxu1 %v2066_v61  ;;  %568 = vmatpush.msra.mxu0 %v2022_v62  ;;  %v2557_v27 = vsel %vm460_vm1, %v467_v21, %v468_v22  ;;  %v2060_v35 = vld [vmem:[%s3399_s1 + $0x160] sm:$0xff]  ;;  %v473_v37 = vrot.slane %v404_v33, 1  ;;  %v2058_v42 = vld [vmem:[%s3399_s1 + $0x150] sm:$0xff]  ;;  %v494_v46 = vrot.slane %v417_v39, 1  ;;  %v371_v48 = vld [vmem:[%s2381_s26 + $0xa8] sm:$0xff] }
  0x27   : > { %674 = vmatpush.msra.mxu2 %v378_v63  ;;  %v364_v44 = vld [vmem:[%s2381_s26 + $0x40] sm:$0xff]  ;;  %v410_v50 = vld [vmem:[%s2381_s26 + $0x70] sm:$0x1]  ;;  %v2057_v51 = vld [vmem:[%s3399_s1 + $0x148] sm:$0xff] }
  0x28   : > { %2042 = vmatmul.msk.f32.gmra.mxu1 %vm538_vm0, %v2507_v1  ;;  %569 = vmatpush.msra.mxu0 %v2021_v0  ;;  %v2582_v43 = vsel %vm460_vm1, %v473_v37, %v474_v38  ;;  %v408_v49 = vld [vmem:[%s2381_s26 + $0x60] sm:$0xfe]  ;;  %v2594_v52 = vsel %vm460_vm1, %v494_v46, %v495_v47  ;;  %v480_v54 = vrot.slane %v410_v50, 1  ;;  %v421_v55 = vld [vmem:[%s2381_s26 + $0xc8] sm:$0xfe] }
  0x29   : > { %907 = vmatpush.msrb.mxu1 %v2065_v6  ;;  %675 = vmatpush.msra.mxu2 %v377_v7  ;;  %v479_v53 = vrot.slane %v408_v49, 1  ;;  %v423_v56 = vld [vmem:[%s2381_s26 + $0xd8] sm:$0x1]  ;;  %v2056_v57 = vld [vmem:[%s3399_s1 + $0x140] sm:$0xff]  ;;  %v500_v60 = vrot.slane %v421_v55, 1  ;;  %v373_v62 = vld [vmem:[%s2381_s26 + $0xc8] sm:$0xff] }
  0x2a   : > { %570 = vmatpush.msra.mxu0 %v2020_v8  ;;  %v366_v59 = vld [vmem:[%s2381_s26 + $0x60] sm:$0xff]  ;;  %v501_v61 = vrot.slane %v423_v56, 1  ;;  %v414_v0 = vld [vmem:[%s2381_s26 + $0x90] sm:$0x1]  ;;  %v425_v5 = vld [vmem:[%s2381_s26 + $0xe8] sm:$0xfe] }
  0x2b   : > { %908 = vmatpush.msrb.mxu1 %v2064_v9  ;;  %676 = vmatpush.msra.mxu2 %v376_v11  ;;  %v2604_v58 = vsel %vm460_vm1, %v479_v53, %v480_v54  ;;  %v412_v63 = vld [vmem:[%s2381_s26 + $0x80] sm:$0xfe]  ;;  %v486_v4 = vrot.slane %v414_v0, 1  ;;  %v427_v6 = vld [vmem:[%s2381_s26 + $0xf8] sm:$0x1]  ;;  %v506_v9 = vrot.slane %v425_v5, 1 }
  0x2c   : > { %571 = vmatmul.f32.vlgmr.msra.gmra.mxu0 %v2532_v12  ;;  %677 = vmatmul.f32.vlgmr.msra.gmra.mxu2 %v360_v13  ;;  %v2613_v2 = vsel %vm460_vm1, %v500_v60, %v501_v61  ;;  %v485_v3 = vrot.slane %v412_v63, 1  ;;  %v368_v8 = vld [vmem:[%s2381_s26 + $0x80] sm:$0xff]  ;;  %v507_v10 = vrot.slane %v427_v6, 1  ;;  %v375_v11 = vld [vmem:[%s2381_s26 + $0xe8] sm:$0xff]  ;;  %v418_v14 = vld [vmem:[%s2381_s26 + $0xb0] sm:$0x1] }
  0x2d   : > { %2051 = vmatmul.msk.f32.gmra.mxu3 %vm538_vm0, %v367_v16  ;;  %909 = vmatpush.msrb.mxu1 %v2063_v19  ;;  %v416_v13 = vld [vmem:[%s2381_s26 + $0xa0] sm:$0xfe]  ;;  %v744_v15 = vld [vmem:[%s2381_s26 + $0x8] sm:$0xfc]  ;;  %v746_v16 = vld [vmem:[%s2381_s26 + $0x18] sm:$0x3] }
  0x2e   : > { %v2620_v7 = vsel %vm460_vm1, %v485_v3, %v486_v4  ;;  %v2631_v17 = vsel %vm460_vm1, %v506_v9, %v507_v10  ;;  %v491_v18 = vrot.slane %v416_v13, 1  ;;  %v492_v19 = vrot.slane %v418_v14, 1  ;;  %v743_v23 = vld [vmem:[%s2381_s26] sm:$0xfc]  ;;  %v745_v24 = vld [vmem:[%s2381_s26 + $0x10] sm:$0x3] }
  0x2f   : > { %910 = vmatpush.msrb.mxu1 %v2062_v25  ;;  %3411 = vst [vmem:[#allocation2_spill] sm:$0xff] %v2631_v17  ;;  %v811_v21 = vrot.slane %v744_v15, 2  ;;  %v812_v22 = vrot.slane %v746_v16, 2  ;;  %v370_v30 = vld [vmem:[%s2381_s26 + $0xa0] sm:$0xff]  ;;  %v422_v33 = vld [vmem:[%s2381_s26 + $0xd0] sm:$0x1] }
  0x30   : > { %2043 = vmatmul.msk.f32.gmra.mxu1 %vm538_vm0, %v2544_v20  ;;  %v2638_v25 = vsel %vm460_vm1, %v491_v18, %v492_v19  ;;  %v748_v34 = vld [vmem:[%s2381_s26 + $0x28] sm:$0xfc]  ;;  %v498_v39 = vrot.slane %v422_v33, 1  ;;  %v372_v49 = vld [vmem:[%s2381_s26 + $0xc0] sm:$0xff]  ;;  %v426_v53 = vld [vmem:[%s2381_s26 + $0xf0] sm:$0x1] }
  0x31   : > { %911 = vmatpush.msrb.mxu1 %v2061_v26  ;;  %v808_v26 = vrot.slane %v743_v23, 2  ;;  %v813_v31 = vsel %vm807_vm2, %v811_v21, %v812_v22  ;;  %v817_v40 = vrot.slane %v748_v34, 2  ;;  %v752_v54 = vld [vmem:[%s2381_s26 + $0x48] sm:$0xfc]  ;;  %v754_v55 = vld [vmem:[%s2381_s26 + $0x58] sm:$0x3] }
  0x32   : > { %v823_v60 = vrot.slane %v752_v54, 2  ;;  %v824_v61 = vrot.slane %v754_v55, 2  ;;  %v753_v63 = vld [vmem:[%s2381_s26 + $0x50] sm:$0x3]  ;;  %v374_v5 = vld [vmem:[%s2381_s26 + $0xe0] sm:$0xff] }
  0x33   : > { %912 = vmatpush.msrb.mxu1 %v2060_v35  ;;  %v750_v35 = vld [vmem:[%s2381_s26 + $0x38] sm:$0x3]  ;;  %v821_v4 = vrot.slane %v753_v63, 2  ;;  %v755_v14 = vld [vmem:[%s2381_s26 + $0x60] sm:$0xfc] }
  0x34   : > { %574 = vmatmul.f32.gmra.mxu0 %v2557_v27  ;;  %680 = vmatmul.f32.gmra.mxu2 %v362_v28  ;;  %v809_v28 = vrot.slane %v745_v24, 2  ;;  %v825_v6 = vsel %vm807_vm2, %v823_v60, %v824_v61  ;;  %v758_v9 = vld [vmem:[%s2381_s26 + $0x78] sm:$0x3]  ;;  %v757_v15 = vld [vmem:[%s2381_s26 + $0x70] sm:$0x3]  ;;  %v826_v16 = vrot.slane %v755_v14, 2 }
  0x35   : > { %2052 = vmatmul.msk.f32.gmra.mxu3 %vm538_vm0, %v369_v32  ;;  %913 = vmatpush.msrb.mxu1 %v2059_v41  ;;  %v420_v32 = vld [vmem:[%s2381_s26 + $0xc0] sm:$0xfe]  ;;  %v818_v41 = vrot.slane %v750_v35, 2  ;;  %v830_v13 = vrot.slane %v758_v9, 2  ;;  %v827_v18 = vrot.slane %v757_v15, 2  ;;  %v2720_v9 = vld [vmem:[%s3407_s9 + $0x68] sm:$0xff] }
  0x36   : > { %v810_v37 = vsel %vm807_vm2, %v808_v26, %v809_v28  ;;  %v497_v38 = vrot.slane %v420_v32, 1  ;;  %v760_v21 = vld [vmem:[%s2381_s26 + $0x88] sm:$0xfc]  ;;  %v762_v22 = vld [vmem:[%s2381_s26 + $0x98] sm:$0x3]  ;;  %v2727_v14 = vld [vmem:[%s3407_s9 + $0x60] sm:$0xff] }
  0x37   : > { %914 = vmatpush.msrb.mxu1 %v2058_v42  ;;  %v747_v42 = vld [vmem:[%s2381_s26 + $0x20] sm:$0xfc]  ;;  %v819_v50 = vsel %vm807_vm2, %v817_v40, %v818_v41  ;;  %v828_v23 = vsel %vm807_vm2, %v826_v16, %v827_v18  ;;  %v835_v24 = vrot.slane %v760_v21, 2  ;;  %v836_v26 = vrot.slane %v762_v22, 2  ;;  %v764_v34 = vld [vmem:[%s2381_s26 + $0xa8] sm:$0xfc] }
  0x38   : > { %2044 = vmatmul.msk.f32.gmra.mxu1 %vm538_vm0, %v2569_v36  ;;  %v2652_v46 = vsel %vm460_vm1, %v497_v38, %v498_v39  ;;  %v814_v47 = vrot.slane %v747_v42, 2  ;;  %v759_v28 = vld [vmem:[%s2381_s26 + $0x80] sm:$0xfc]  ;;  %v766_v35 = vld [vmem:[%s2381_s26 + $0xb8] sm:$0x3]  ;;  %v841_v38 = vrot.slane %v764_v34, 2 }
  0x39   : > { %915 = vmatpush.msrb.mxu1 %v2057_v51  ;;  %v424_v51 = vld [vmem:[%s2381_s26 + $0xe0] sm:$0xfe]  ;;  %v837_v33 = vsel %vm807_vm2, %v835_v24, %v836_v26  ;;  %v842_v39 = vrot.slane %v766_v35, 2  ;;  %v765_v41 = vld [vmem:[%s2381_s26 + $0xb0] sm:$0x3]  ;;  %v2735_v16 = vld [vmem:[%s3407_s9 + $0x58] sm:$0xff] }
  0x3a   : > { %v763_v40 = vld [vmem:[%s2381_s26 + $0xa0] sm:$0xfc]  ;;  %v769_v55 = vld [vmem:[%s2381_s26 + $0xd0] sm:$0x3]  ;;  %v774_v63 = vld [vmem:[%s2381_s26 + $0xf8] sm:$0x3] }
  0x3b   : > { %916 = vmatpush.msrb.mxu1 %v2056_v57  ;;  %v503_v57 = vrot.slane %v424_v51, 1  ;;  %v838_v42 = vrot.slane %v763_v40, 2  ;;  %v767_v54 = vld [vmem:[%s2381_s26 + $0xc0] sm:$0xfc]  ;;  %v845_v60 = vrot.slane %v769_v55, 2  ;;  %v2740_v18 = vld [vmem:[%s3407_s9 + $0x50] sm:$0xff] }
  0x3c   : > { %577 = vmatmul.f32.gmra.mxu0 %v2582_v43  ;;  %683 = vmatmul.f32.gmra.mxu2 %v364_v44  ;;  %v749_v44 = vld [vmem:[%s2381_s26 + $0x30] sm:$0x3]  ;;  %v2747_v22 = vld [vmem:[%s3407_s9 + $0x48] sm:$0xff]  ;;  %v2782_v34 = vld [vmem:[%s3407_s9 + $0x20] sm:$0xff] }
  0x3d   : > { %2053 = vmatmul.msk.f32.gmra.mxu3 %vm538_vm0, %v371_v48  ;;  %v815_v48 = vrot.slane %v749_v44, 2  ;;  %v839_v44 = vrot.slane %v765_v41, 2 }
  0x3f   : > { %v816_v56 = vsel %vm807_vm2, %v814_v47, %v815_v48  ;;  %v843_v47 = vsel %vm807_vm2, %v841_v38, %v842_v39  ;;  %v768_v48 = vld [vmem:[%s2381_s26 + $0xc8] sm:$0xfc]  ;;  %v2793_v38 = vld [vmem:[%s3407_s9 + $0x18] sm:$0xff]  ;;  %v2798_v39 = vld [vmem:[%s3407_s9 + $0x10] sm:$0xff] }
  0x40   : > { %2045 = vmatmul.msk.f32.gmra.mxu1 %vm538_vm0, %v2594_v52  ;;  %v847_v51 = vrot.slane %v768_v48, 2 }
  0x44   : > { %580 = vmatmul.f32.gmra.mxu0 %v2604_v58  ;;  %686 = vmatmul.f32.gmra.mxu2 %v366_v59  ;;  %v504_v59 = vrot.slane %v426_v53, 1 }
  0x45   : > { %2054 = vmatmul.msk.f32.gmra.mxu3 %vm538_vm0, %v373_v62  ;;  %v751_v62 = vld [vmem:[%s2381_s26 + $0x40] sm:$0xfc] }
  0x46   : > { %v2666_v0 = vsel %vm460_vm1, %v503_v57, %v504_v59  ;;  %v820_v3 = vrot.slane %v751_v62, 2  ;;  %v2706_v57 = vld [vmem:[%s3407_s9 + $0x70] sm:$0xff]  ;;  %v844_v59 = vrot.slane %v767_v54, 2  ;;  %v772_v62 = vld [vmem:[%s2381_s26 + $0xe8] sm:$0xfc] }
  0x47   : > { %3412 = vst [vmem:[#allocation3_spill] sm:$0xff] %v2666_v0 }
  0x48   : > { %2046 = vmatmul.msk.f32.gmra.mxu1 %vm538_vm0, %v2613_v2  ;;  %v822_v10 = vsel %vm807_vm2, %v820_v3, %v821_v4  ;;  %v846_v3 = vsel %vm807_vm2, %v844_v59, %v845_v60  ;;  %v853_v4 = vrot.slane %v772_v62, 2 }
  0x4c   : > { %583 = vmatmul.f32.gmra.mxu0 %v2620_v7  ;;  %689 = vmatmul.f32.gmra.mxu2 %v368_v8  ;;  %v756_v8 = vld [vmem:[%s2381_s26 + $0x68] sm:$0xfc] }
  0x4d   : > { %2055 = vmatmul.msk.f32.gmra.mxu3 %vm538_vm0, %v375_v11  ;;  %v829_v11 = vrot.slane %v756_v8, 2  ;;  %v773_v8 = vld [vmem:[%s2381_s26 + $0xf0] sm:$0x3] }
  0x4f   : > { %v831_v19 = vsel %vm807_vm2, %v829_v11, %v830_v13  ;;  %v851_v11 = vrot.slane %v773_v8, 2 }
  0x50   : > { %2047 = vmatmul.msk.f32.gmra.mxu1 %vm538_vm0, %v2631_v17 }
  0x54   : > { %586 = vmatmul.f32.gmra.mxu0 %v2638_v25  ;;  %692 = vmatmul.f32.gmra.mxu2 %v370_v30  ;;  %v761_v30 = vld [vmem:[%s2381_s26 + $0x90] sm:$0x3] }
  0x55   : > { %2076 = vmatmul.msk.f32.vlgmr.msrb.gmra.mxu3 %vm538_vm0, %v813_v31  ;;  %v832_v31 = vrot.slane %v759_v28, 2  ;;  %v833_v32 = vrot.slane %v761_v30, 2  ;;  %v2761_v28 = vld [vmem:[%s3407_s9 + $0x38] sm:$0xff]  ;;  %v2766_v30 = vld [vmem:[%s3407_s9 + $0x30] sm:$0xff] }
  0x58   : > { %917 = vmatmul.f32.vlgmr.msrb.gmra.mxu1 %v810_v37  ;;  %v834_v37 = vsel %vm807_vm2, %v832_v31, %v833_v32 }
  0x5c   : > { %589 = vmatmul.f32.gmra.mxu0 %v2652_v46  ;;  %695 = vmatmul.f32.gmra.mxu2 %v372_v49  ;;  %v770_v49 = vld [vmem:[%s2381_s26 + $0xd8] sm:$0x3] }
  0x5d   : > { %2077 = vmatmul.msk.f32.gmra.mxu3 %vm538_vm0, %v819_v50  ;;  %v840_v50 = vsel %vm807_vm2, %v838_v42, %v839_v44  ;;  %v848_v53 = vrot.slane %v770_v49, 2  ;;  %v2811_v44 = vld [vmem:[%s3407_s9 + $0x8] sm:$0xff] }
  0x5f   : > { %v849_v61 = vsel %vm807_vm2, %v847_v51, %v848_v53 }
  0x60   : > { %920 = vmatmul.f32.gmra.mxu1 %v816_v56  ;;  %v2701_v56 = vld [vmem:[%s3407_s9 + $0x78] sm:$0xff] }
  0x61   : > { %1027 = vmatpush.msrb.mxu0 %v2701_v56 }
  0x63   : > { %1028 = vmatpush.msrb.mxu0 %v2706_v57 }
  0x64   : > { %592 = vmatmul.f32.gmra.mxu0 %v2666_v0  ;;  %698 = vmatmul.f32.gmra.mxu2 %v374_v5  ;;  %v854_v5 = vrot.slane %v774_v63, 2 }
  0x65   : > { %2078 = vmatmul.msk.f32.gmra.mxu3 %vm538_vm0, %v825_v6  ;;  %v771_v6 = vld [vmem:[%s2381_s26 + $0xe0] sm:$0xfc]  ;;  %1029 = vmatpush.msrb.mxu0 %v2720_v9  ;;  %s2272_s26 = smov 112  }
  0x66   : > { %v855_v13 = vsel %vm807_vm2, %v853_v4, %v854_v5  ;;  %1891 = vrot.lane.b32.xlu0 %v2532_v12, %s2272_s26  ;;  %1895 = vrot.lane.b32.xlu1 %v2557_v27, %s2272_s26  ;;  %v1844_v12 = vld [vmem:[%s3405_s7 + $0x70] sm:$0xff]  ;;  %v1842_v27 = vld [vmem:[%s3405_s7 + $0x60] sm:$0xff] }
  0x67   : > { %1030 = vmatpush.msrb.mxu0 %v2727_v14  ;;  %1899 = vrot.lane.b32.xlu2 %v2582_v43, %s2272_s26 }
  0x68   : > { %923 = vmatmul.f32.gmra.mxu1 %v822_v10  ;;  %v850_v10 = vrot.slane %v771_v6, 2 }
  0x69   : > { %1031 = vmatpush.msrb.mxu0 %v2735_v16 }
  0x6a   : > { %v852_v15 = vsel %vm807_vm2, %v850_v10, %v851_v11  ;;  %v2845_v10 = vld [vmem:[%s3400_s2] ss:$0 sm:$0xff] }
  0x6b   : > { %1032 = vmatpush.msrb.mxu0 %v2740_v18 }
  0x6d   : > { %2079 = vmatmul.msk.f32.gmra.mxu3 %vm538_vm0, %v831_v19  ;;  %1033 = vmatpush.msrb.mxu0 %v2747_v22 }
  0x6e   : > { %1893 = vrot.lane.b32.xlu0 %v2421_v29, %s2272_s26  ;;  %1897 = vrot.lane.b32.xlu1 %v2460_v45, %s2272_s26  ;;  %v3415_v29 = vld [vmem:[#allocation3_spill] sm:$0xff]  ;;  %v3416_v45 = vld [vmem:[#allocation2_spill] sm:$0xff] }
  0x6f   : > { %1901 = vrot.lane.b32.xlu2 %v2507_v1, %s2272_s26  ;;  %v1845_v1 = vld [vmem:[%s3405_s7 + $0x78] sm:$0xff] }
  0x70   : > { %926 = vmatmul.f32.gmra.mxu1 %v828_v23  ;;  %v2752_v23 = vld [vmem:[%s3407_s9 + $0x40] sm:$0xff] }
  0x71   : > { %1034 = vmatpush.msrb.mxu0 %v2752_v23 }
  0x73   : > { %1035 = vmatpush.msrb.mxu0 %v2761_v28 }
  0x75   : > { %2080 = vmatmul.msk.f32.gmra.mxu3 %vm538_vm0, %v837_v33  ;;  %1036 = vmatpush.msrb.mxu0 %v2766_v30  ;;  %v2777_v33 = vld [vmem:[%s3407_s9 + $0x28] sm:$0xff] }
  0x76   : > { %1905 = vrot.lane.b32.xlu1 %v2544_v20, %s2272_s26  ;;  %1903 = vrot.lane.b32.xlu0 %v2604_v58, %s2272_s26  ;;  %v1843_v20 = vld [vmem:[%s3405_s7 + $0x68] sm:$0xff]  ;;  %v1840_v58 = vld [vmem:[%s3405_s7 + $0x50] sm:$0xff] }
  0x77   : > { %1037 = vmatpush.msrb.mxu0 %v2777_v33  ;;  %1907 = vrot.lane.b32.xlu2 %v2620_v7, %s2272_s26 }
  0x78   : > { %929 = vmatmul.f32.gmra.mxu1 %v834_v37 }
  0x79   : > { %1038 = vmatpush.msrb.mxu0 %v2782_v34 }
  0x7b   : > { %1039 = vmatpush.msrb.mxu0 %v2793_v38 }
  0x7d   : > { %2081 = vmatmul.msk.f32.gmra.mxu3 %vm538_vm0, %v843_v47  ;;  %1040 = vmatpush.msrb.mxu0 %v2798_v39  ;;  %v2816_v47 = vld [vmem:[%s3407_s9] sm:$0xff] }
  0x7e   : > { %1909 = vrot.lane.b32.xlu0 %v2569_v36, %s2272_s26  ;;  %1911 = vrot.lane.b32.xlu1 %v2638_v25, %s2272_s26 }
  0x7f   : > { %1041 = vmatpush.msrb.mxu0 %v2811_v44  ;;  %1913 = vrot.lane.b32.xlu2 %v2594_v52, %s2272_s26  ;;  %v1841_v52 = vld [vmem:[%s3405_s7 + $0x58] sm:$0xff] }
  0x80   : > { %932 = vmatmul.f32.gmra.mxu1 %v840_v50 }
  0x81   : > { %1042 = vmatpush.msrb.mxu0 %v2816_v47 }
  0x83   : > { %1529 = vmatpush.msra.mxu0 %v2701_v56 }
  0x85   : > { %2082 = vmatmul.msk.f32.gmra.mxu3 %vm538_vm0, %v849_v61  ;;  %1530 = vmatpush.msra.mxu0 %v2706_v57 }
  0x86   : > { %1917 = vrot.lane.b32.xlu1 %v2613_v2, %s2272_s26  ;;  %1915 = vrot.lane.b32.xlu0 %v2652_v46, %s2272_s26 }
  0x87   : > { %1531 = vmatpush.msra.mxu0 %v2720_v9  ;;  %1919 = vrot.lane.b32.xlu2 %v3415_v29, %s2272_s26 }
  0x88   : > { %935 = vmatmul.f32.gmra.mxu1 %v846_v3 }
  0x89   : > { %1532 = vmatpush.msra.mxu0 %v2727_v14 }
  0x8b   : > { %1533 = vmatpush.msra.mxu0 %v2735_v16 }
  0x8d   : > { %2083 = vmatmul.msk.f32.gmra.mxu3 %vm538_vm0, %v855_v13  ;;  %1534 = vmatpush.msra.mxu0 %v2740_v18 }
  0x8e   : > { %1921 = vrot.lane.b32.xlu0 %v3416_v45, %s2272_s26 }
  0x8f   : > { %1535 = vmatpush.msra.mxu0 %v2747_v22 }
  0x90   : > { %938 = vmatmul.f32.gmra.mxu1 %v852_v15 }
  0x91   : > { %1536 = vmatpush.msra.mxu0 %v2752_v23 }
  0x93   : > { %1537 = vmatpush.msra.mxu0 %v2761_v28 }
  0x95   : > { %v613_v19 = vpop.f32.mrf.mxu1  ;;  %1538 = vmatpush.msra.mxu0 %v2766_v30 }
  0x97   : > { %1539 = vmatpush.msra.mxu0 %v2777_v33 }
  0x98   : > { %v719_v21 = vpop.f32.mrf.mxu3 }
  0x99   : > { %1540 = vmatpush.msra.mxu0 %v2782_v34 }
  0x9b   : > { %1541 = vmatpush.msra.mxu0 %v2793_v38 }
  0x9d   : > { %v616_v24 = vpop.f32.mrf.mxu1  ;;  %1542 = vmatpush.msra.mxu0 %v2798_v39 }
  0x9f   : > { %1543 = vmatpush.msra.mxu0 %v2811_v44 }
  0xa0   : > { %v2756_v26 = vpop.f32.mrf.mxu3 }
  0xa1   : > { %1544 = vmatpush.msra.mxu0 %v2816_v47 }
  0xa5   : > { %v2769_v31 = vpop.f32.mrf.mxu1 }
  0xa8   : > { %v2772_v32 = vpop.f32.mrf.mxu3 }
  0xa9   : > { %v572_v49 = vpop.f32.mrf.mxu0 }
  0xaa   : > { %v614_v61 = vadd.f32 %v613_v19, %v572_v49 }
  0xad   : > { %v2785_v35 = vpop.f32.mrf.mxu1 }
  0xaf   : > { %v678_v50 = vpop.f32.mrf.mxu2 }
  0xb0   : > { %v2788_v37 = vpop.f32.mrf.mxu3  ;;  %v679_v62 = vadd.f32 %v678_v50, %v614_v61 }
  0xb1   : > { %v575_v54 = vpop.f32.mrf.mxu0 }
  0xb2   : > { %v720_v6 = vadd.f32 %v719_v21, %v679_v62  ;;  %v617_v11 = vadd.f32 %v616_v24, %v575_v54 }
  0xb5   : > { %v2801_v40 = vpop.f32.mrf.mxu1 }
  0xb7   : > { %v681_v59 = vpop.f32.mrf.mxu2 }
  0xb8   : > { %v2804_v41 = vpop.f32.mrf.mxu3  ;;  %v682_v15 = vadd.f32 %v681_v59, %v617_v11 }
  0xb9   : > { %v578_v3 = vpop.f32.mrf.mxu0 }
  0xba   : > { %v723_v62 = vadd.f32 %v2756_v26, %v682_v15  ;;  %v620_v59 = vadd.f32 %v2769_v31, %v578_v3 }
  0xbd   : > { %v2806_v42 = vpop.f32.mrf.mxu1 }
  0xbf   : > { %v684_v4 = vpop.f32.mrf.mxu2 }
  0xc0   : > { %v2819_v48 = vpop.f32.mrf.mxu3 }
  0xc1   : > { %v581_v50 = vpop.f32.mrf.mxu0 }
  0xc2   : > { %v623_v15 = vadd.f32 %v2785_v35, %v581_v50 }
  0xc5   : > { %v2824_v51 = vpop.f32.mrf.mxu1 }
  0xc7   : > { %v687_v54 = vpop.f32.mrf.mxu2 }
  0xc8   : > { %v2828_v53 = vpop.f32.mrf.mxu3  ;;  %v688_v31 = vadd.f32 %v687_v54, %v623_v15 }
  0xc9   : > { %v584_v26 = vpop.f32.mrf.mxu0 }
  0xcd   : > { %v2832_v55 = vpop.f32.mrf.mxu1 }
  0xd0   : > { %v2836_v60 = vpop.f32.mrf.mxu3 }
  0xd5   : > { %v918_v63 = vpop.f32.mrf.mxu1 }
  0xd8   : > { %v959_v5 = vpop.f32.mrf.mxu3 }
  0xd9   : > { %v960_v8 = vadd.f32 %v959_v5, %v918_v63  ;;  %v685_v5 = vadd.f32 %v684_v4, %v620_v59 }
  0xdb   : > { %v983_v13 = vadd.f32 %v960_v8, %v720_v6  ;;  %v726_v17 = vadd.f32 %v2772_v32, %v685_v5  ;;  %v626_v32 = vadd.f32 %v2801_v40, %v584_v26  ;;  %v587_v5 = vpop.f32.mrf.mxu0 }
  0xdc   : > { %v629_v40 = vadd.f32 %v2806_v42, %v587_v5 }
  0xdd   : > { %v2850_v19 = vadd.f32 %v2845_v10, %v983_v13  ;;  %v921_v49 = vpop.f32.mrf.mxu1 }
  0xdf   : > { %v1003_v21 = vmul.f32 %v2850_v19, %v2850_v19 }
  0xe0   : > { %v962_v61 = vpop.f32.mrf.mxu3 }
  0xe1   : > { %v963_v24 = vadd.f32 %v962_v61, %v921_v49  ;;  %1043 = vmatmul.f32.vlgmr.msrb.gmra.mxu0 %v1003_v21  ;;  %v690_v21 = vpop.f32.mrf.mxu2 }
  0xe2   : > { %v691_v35 = vadd.f32 %v690_v21, %v626_v32 }
  0xe3   : > { %v984_v63 = vadd.f32 %v963_v24, %v723_v62  ;;  %v729_v24 = vadd.f32 %v2788_v37, %v688_v31  ;;  %v2099_v37 = vld [vmem:[%s3402_s4 + $0xf8] sm:$0xff]  ;;  %v590_v31 = vpop.f32.mrf.mxu0 }
  0xe4   : > { %1361 = vmatpush.msrb.mxu2 %v2099_v37 }
  0xe5   : > { %v924_v6 = vpop.f32.mrf.mxu1  ;;  %v2859_v8 = vadd.f32 %v2845_v10, %v984_v63 }
  0xe7   : > { %v1004_v11 = vmul.f32 %v2859_v8, %v2859_v8 }
  0xe8   : > { %v965_v13 = vpop.f32.mrf.mxu3 }
  0xe9   : > { %v966_v0 = vadd.f32 %v965_v13, %v924_v6  ;;  %1046 = vmatmul.f32.gmra.mxu0 %v1004_v11  ;;  %v693_v50 = vpop.f32.mrf.mxu2  ;;  %v732_v11 = vadd.f32 %v2804_v41, %v691_v35 }
  0xea   : > { %v694_v15 = vadd.f32 %v693_v50, %v629_v40 }
  0xeb   : > { %v985_v49 = vadd.f32 %v966_v0, %v726_v17 }
  0xed   : > { %v927_v3 = vpop.f32.mrf.mxu1  ;;  %v2866_v4 = vadd.f32 %v2845_v10, %v985_v49 }
  0xef   : > { %v1005_v61 = vmul.f32 %v2866_v4, %v2866_v4 }
  0xf0   : > { %v968_v62 = vpop.f32.mrf.mxu3 }
  0xf1   : > { %v969_v59 = vadd.f32 %v968_v62, %v927_v3  ;;  %1049 = vmatmul.f32.gmra.mxu0 %v1005_v61  ;;  %v696_v41 = vpop.f32.mrf.mxu2  ;;  %v735_v62 = vadd.f32 %v2819_v48, %v694_v15 }
  0xf3   : > { %v986_v63 = vadd.f32 %v969_v59, %v729_v24  ;;  %v632_v59 = vadd.f32 %v2824_v51, %v590_v31 }
  0xf5   : > { %v930_v17 = vpop.f32.mrf.mxu1  ;;  %v2873_v0 = vadd.f32 %v2845_v10, %v986_v63  ;;  %v697_v42 = vadd.f32 %v696_v41, %v632_v59  ;;  %v1343_v41 = vld [vmem:[%s3402_s4 + $0x78] sm:$0xff]  ;;  %v1341_v59 = vld [vmem:[%s3402_s4 + $0x68] sm:$0xff] }
  0xf6   : > { %1402 = vmatpush.msra.mxu1 %v1343_v41  ;;  %v1332_v41 = vld [vmem:[%s3402_s4 + $0x20] sm:$0xff] }
  0xf7   : > { %v1006_v54 = vmul.f32 %v2873_v0, %v2873_v0 }
  0xf8   : > { %v971_v6 = vpop.f32.mrf.mxu3 }
  0xf9   : > { %v972_v13 = vadd.f32 %v971_v6, %v930_v17  ;;  %1052 = vmatmul.f32.gmra.mxu0 %v1006_v54  ;;  %v593_v17 = vpop.f32.mrf.mxu0  ;;  %v738_v54 = vadd.f32 %v2828_v53, %v697_v42  ;;  %v699_v48 = vpop.f32.mrf.mxu2  ;;  %v1339_v42 = vld [vmem:[%s3402_s4 + $0x58] sm:$0xff] }
  0xfb   : > { %v987_v26 = vadd.f32 %v972_v13, %v732_v11  ;;  %v635_v11 = vadd.f32 %v2832_v55, %v593_v17  ;;  %v2096_v17 = vld [vmem:[%s3402_s4 + $0xe0] sm:$0xff] }
  0xfd   : > { %v933_v49 = vpop.f32.mrf.mxu1  ;;  %v2883_v21 = vadd.f32 %v2845_v10, %v987_v26  ;;  %v700_v51 = vadd.f32 %v699_v48, %v635_v11  ;;  %v1336_v48 = vld [vmem:[%s3402_s4 + $0x40] sm:$0xff] }
  0xff   : > { %v1007_v3 = vmul.f32 %v2883_v21, %v2883_v21 }
 0x100   : > { %v974_v61 = vpop.f32.mrf.mxu3 }
 0x101   : > { %v975_v24 = vadd.f32 %v974_v61, %v933_v49  ;;  %1055 = vmatmul.f32.gmra.mxu0 %v1007_v3  ;;  %v741_v49 = vadd.f32 %v2836_v60, %v700_v51  ;;  %v1342_v61 = vld [vmem:[%s3402_s4 + $0x70] sm:$0xff]  ;;  %v2115_v60 = vld [vmem:[%s3402_s4 + $0x178] sm:$0xff] }
 0x102   : > { %1403 = vmatpush.msra.mxu1 %v1342_v61  ;;  %1460 = vmatpush.msra.mxu3 %v2115_v60  ;;  %v1335_v51 = vld [vmem:[%s3402_s4 + $0x38] sm:$0xff] }
 0x103   : > { %v988_v32 = vadd.f32 %v975_v24, %v735_v62  ;;  %v2114_v62 = vld [vmem:[%s3402_s4 + $0x170] sm:$0xff]  ;;  %v2097_v24 = vld [vmem:[%s3402_s4 + $0xe8] sm:$0xff] }
 0x104   : > { %1404 = vmatpush.msra.mxu1 %v1341_v59  ;;  %1461 = vmatpush.msra.mxu3 %v2114_v62  ;;  %v2091_v62 = vld [vmem:[%s3402_s4 + $0xb8] sm:$0xff] }
 0x105   : > { %v936_v63 = vpop.f32.mrf.mxu1  ;;  %v2890_v5 = vadd.f32 %v2845_v10, %v988_v32  ;;  %v1340_v32 = vld [vmem:[%s3402_s4 + $0x60] sm:$0xff] }
 0x106   : > { %1405 = vmatpush.msra.mxu1 %v1340_v32  ;;  %v2090_v32 = vld [vmem:[%s3402_s4 + $0xb0] sm:$0xff] }
 0x107   : > { %v1008_v35 = vmul.f32 %v2890_v5, %v2890_v5 }
 0x108   : > { %v977_v50 = vpop.f32.mrf.mxu3  ;;  %1406 = vmatpush.msra.mxu1 %v1339_v42  ;;  %v1330_v42 = vld [vmem:[%s3402_s4 + $0x10] sm:$0xff] }
 0x109   : > { %v978_v6 = vadd.f32 %v977_v50, %v936_v63  ;;  %1058 = vmatmul.f32.gmra.mxu0 %v1008_v35  ;;  %v1338_v63 = vld [vmem:[%s3402_s4 + $0x50] sm:$0xff]  ;;  %v2113_v35 = vld [vmem:[%s3402_s4 + $0x168] sm:$0xff]  ;;  %v2112_v50 = vld [vmem:[%s3402_s4 + $0x160] sm:$0xff] }
 0x10a   : > { %1407 = vmatpush.msra.mxu1 %v1338_v63  ;;  %1462 = vmatpush.msra.mxu3 %v2113_v35  ;;  %v2109_v35 = vld [vmem:[%s3402_s4 + $0x148] sm:$0xff] }
 0x10b   : > { %v989_v13 = vadd.f32 %v978_v6, %v738_v54  ;;  %v2095_v54 = vld [vmem:[%s3402_s4 + $0xd8] sm:$0xff]  ;;  %v1337_v6 = vld [vmem:[%s3402_s4 + $0x48] sm:$0xff] }
 0x10c   : > { %1408 = vmatpush.msra.mxu1 %v1337_v6  ;;  %1463 = vmatpush.msra.mxu3 %v2112_v50  ;;  %v2089_v50 = vld [vmem:[%s3402_s4 + $0xa8] sm:$0xff] }
 0x10d   : > { %v2897_v37 = vadd.f32 %v2845_v10, %v989_v13  ;;  %v939_v40 = vpop.f32.mrf.mxu1 }
 0x10e   : > { %1409 = vmatpush.msra.mxu1 %v1336_v48  ;;  %v2088_v48 = vld [vmem:[%s3402_s4 + $0xa0] sm:$0xff] }
 0x10f   : > { %v1009_v26 = vmul.f32 %v2897_v37, %v2897_v37 }
 0x110   : > { %v980_v15 = vpop.f32.mrf.mxu3  ;;  %1410 = vmatpush.msra.mxu1 %v1335_v51 }
 0x111   : > { %v981_v31 = vadd.f32 %v980_v15, %v939_v40  ;;  %1061 = vmatmul.f32.gmra.mxu0 %v1009_v26  ;;  %v2094_v40 = vld [vmem:[%s3402_s4 + $0xd0] sm:$0xff]  ;;  %v2111_v15 = vld [vmem:[%s3402_s4 + $0x158] sm:$0xff] }
 0x112   : > { %v1334_v26 = vld [vmem:[%s3402_s4 + $0x30] sm:$0xff]  ;;  %1464 = vmatpush.msra.mxu3 %v2111_v15 }
 0x113   : > { %v990_v53 = vadd.f32 %v981_v31, %v741_v49  ;;  %v2110_v49 = vld [vmem:[%s3402_s4 + $0x150] sm:$0xff]  ;;  %v2093_v31 = vld [vmem:[%s3402_s4 + $0xc8] sm:$0xff]  ;;  %1411 = vmatpush.msra.mxu1 %v1334_v26 }
 0x114   : > { %1465 = vmatpush.msra.mxu3 %v2110_v49  ;;  %v2107_v49 = vld [vmem:[%s3402_s4 + $0x138] sm:$0xff] }
 0x115   : > { %v2903_v3 = vadd.f32 %v2845_v10, %v990_v53  ;;  %v2098_v10 = vld [vmem:[%s3402_s4 + $0xf0] sm:$0xff]  ;;  %v1333_v53 = vld [vmem:[%s3402_s4 + $0x28] sm:$0xff] }
 0x116   : > { %1362 = vmatpush.msrb.mxu2 %v2098_v10  ;;  %1412 = vmatpush.msra.mxu1 %v1333_v53  ;;  %v2271_v53 = vmov 0.0  }
 0x117   : > { %v1010_v55 = vmul.f32 %v2903_v3, %v2903_v3  ;;  %1466 = vmatpush.msra.mxu3 %v2109_v35 }
 0x118   : > { %1363 = vmatpush.msrb.mxu2 %v2097_v24  ;;  %1413 = vmatpush.msra.mxu1 %v1332_v41  ;;  %v1331_v24 = vld [vmem:[%s3402_s4 + $0x18] sm:$0xff] }
 0x119   : > { %1064 = vmatmul.f32.gmra.mxu0 %v1010_v55  ;;  %v2092_v55 = vld [vmem:[%s3402_s4 + $0xc0] sm:$0xff] }
 0x11a   : > { %1364 = vmatpush.msrb.mxu2 %v2096_v17  ;;  %1414 = vmatpush.msra.mxu1 %v1331_v24  ;;  %v2108_v17 = vld [vmem:[%s3402_s4 + $0x140] sm:$0xff] }
 0x11b   : > { %1467 = vmatpush.msra.mxu3 %v2108_v17 }
 0x11c   : > { %1365 = vmatpush.msrb.mxu2 %v2095_v54  ;;  %1415 = vmatpush.msra.mxu1 %v1330_v42  ;;  %v1329_v54 = vld [vmem:[%s3402_s4 + $0x8] sm:$0xff] }
 0x11d   : > { %1468 = vmatpush.msra.mxu3 %v2107_v49  ;;  %v2085_v42 = vld [vmem:[%s3402_s4 + $0x88] sm:$0xff] }
 0x11e   : > { %1366 = vmatpush.msrb.mxu2 %v2094_v40  ;;  %1416 = vmatpush.msra.mxu1 %v1329_v54 }
 0x120   : > { %1367 = vmatpush.msrb.mxu2 %v2093_v31  ;;  %v2087_v31 = vld [vmem:[%s3402_s4 + $0x98] sm:$0xff] }
 0x122   : > { %1368 = vmatpush.msrb.mxu2 %v2092_v55 }
 0x124   : > { %1369 = vmatpush.msrb.mxu2 %v2091_v62  ;;  %v2106_v62 = vld [vmem:[%s3402_s4 + $0x130] sm:$0xff] }
 0x125   : > { %1469 = vmatpush.msra.mxu3 %v2106_v62 }
 0x126   : > { %1370 = vmatpush.msrb.mxu2 %v2090_v32  ;;  %v2105_v32 = vld [vmem:[%s3402_s4 + $0x128] sm:$0xff] }
 0x127   : > { %1470 = vmatpush.msra.mxu3 %v2105_v32 }
 0x128   : > { %1371 = vmatpush.msrb.mxu2 %v2089_v50 }
 0x12a   : > { %1372 = vmatpush.msrb.mxu2 %v2088_v48 }
 0x12c   : > { %1373 = vmatpush.msrb.mxu2 %v2087_v31 }
 0x15e   : > { %v1044_v11 = vpop.f32.mrf.mxu0 }
 0x15f   : > { %v1068_v13 = vmax.f32 %v1044_v11, 1e-24  ;;  %v1328_v11 = vld [vmem:[%s3402_s4] sm:$0xff] }
 0x160   : > { %1417 = vmatpush.msra.mxu1 %v1328_v11 }
 0x161   : > { %2167 = vrsqrt.f32 %v1068_v13  ;;  %1418 = vmatmul.f32.vlgmr.msra.gmra.mxu1 %v2271_v53  ;;  %vm1082_vm4 = vweird.f32 %v1068_v13 }
 0x162   : > { %2120 = vmatpush.msrb.mxu1 %v2701_v56  ;;  %v2104_v56 = vld [vmem:[%s3402_s4 + $0x120] sm:$0xff] }
 0x163   : > { %1471 = vmatpush.msra.mxu3 %v2104_v56 }
 0x164   : > { %2121 = vmatpush.msrb.mxu1 %v2706_v57 }
 0x166   : > { %v1047_v61 = vpop.f32.mrf.mxu0  ;;  %2122 = vmatpush.msrb.mxu1 %v2720_v9 }
 0x167   : > { %v2168_v60 = vpop.eup %2167  ;;  %v2982_v10 = vmax.f32 %v1047_v61, 1e-24  ;;  %v3028_v61 = vld [vmem:[%s3401_s3] ss:$0 sm:$0xff] }
 0x168   : > { %v1077_v59 = vmul.f32 %v2168_v60, %v1068_v13  ;;  %vm1083_vm3 = vweird.f32 %v2168_v60  ;;  %v2086_v13 = vld [vmem:[%s3402_s4 + $0x90] sm:$0xff]  ;;  %2123 = vmatpush.msrb.mxu1 %v2727_v14 }
 0x169   : > { %2169 = vrsqrt.f32 %v2982_v10  ;;  %vm1084_vm5 = vmor %vm1082_vm4, %vm1083_vm3  ;;  %1374 = vmatpush.msrb.mxu2 %v2086_v13  ;;  %vm1092_vm7 = vweird.f32 %v2982_v10 }
 0x16a   : > { %v1078_v63 = vmul.f32 %v2168_v60, %v1077_v59  ;;  %2124 = vmatpush.msrb.mxu1 %v2735_v16 }
 0x16b   : > { %1375 = vmatpush.msrb.mxu2 %v2085_v42 }
 0x16c   : > { %v1079_v6 = vmul.f32 0.5, %v1078_v63  ;;  %2125 = vmatpush.msrb.mxu1 %v2740_v18 }
 0x16e   : > { %v1080_v51 = vsub.f32 1.5, %v1079_v6  ;;  %v1050_v40 = vpop.f32.mrf.mxu0  ;;  %v2103_v6 = vld [vmem:[%s3402_s4 + $0x118] sm:$0xff]  ;;  %2126 = vmatpush.msrb.mxu1 %v2747_v22 }
 0x16f   : > { %v2170_v26 = vpop.eup %2169  ;;  %v3015_v15 = vmax.f32 %v1050_v40, 1e-24  ;;  %1472 = vmatpush.msra.mxu3 %v2103_v6 }
 0x170   : > { %v1081_v55 = vmul.f32 %v2168_v60, %v1080_v51  ;;  %v1087_v41 = vmul.f32 %v2170_v26, %v2982_v10  ;;  %vm1093_vm6 = vweird.f32 %v2170_v26  ;;  %v2102_v51 = vld [vmem:[%s3402_s4 + $0x110] sm:$0xff]  ;;  %2127 = vmatpush.msrb.mxu1 %v2752_v23 }
 0x171   : > { %2171 = vrsqrt.f32 %v3015_v15  ;;  %vm1094_vm8 = vmor %vm1092_vm7, %vm1093_vm6  ;;  %1473 = vmatpush.msra.mxu3 %v2102_v51  ;;  %vm1102_vm10 = vweird.f32 %v3015_v15 }
 0x172   : > { %v1085_v24 = vsel %vm1084_vm5, %v2168_v60, %v1081_v55  ;;  %v1088_v59 = vmul.f32 %v2170_v26, %v1087_v41  ;;  %v2084_v60 = vld [vmem:[%s3402_s4 + $0x80] sm:$0xff]  ;;  %v2101_v55 = vld [vmem:[%s3402_s4 + $0x108] sm:$0xff]  ;;  %2128 = vmatpush.msrb.mxu1 %v2761_v28 }
 0x173   : > { %v1156_v63 = vmul.f32 %v1085_v24, %v2850_v19  ;;  %1376 = vmatpush.msrb.mxu2 %v2084_v60  ;;  %1474 = vmatpush.msra.mxu3 %v2101_v55 }
 0x174   : > { %v1089_v35 = vmul.f32 0.5, %v1088_v59  ;;  %2129 = vmatpush.msrb.mxu1 %v2766_v30 }
 0x175   : > { %v3054_v17 = vmul.f32 %v3028_v61, %v1156_v63  ;;  %1850 = vmatpush.msra.mxu2 %v1845_v1 }
 0x176   : > { %v1090_v50 = vsub.f32 1.5, %v1089_v35  ;;  %v1053_v19 = vpop.f32.mrf.mxu0  ;;  %2130 = vmatpush.msrb.mxu1 %v2777_v33 }
 0x177   : > { %v2172_v57 = vpop.eup %2171  ;;  %v1071_v54 = vmax.f32 %v1053_v19, 1e-24  ;;  %v1176_v48 = vsub.f32 0.0, %v3054_v17  ;;  %1851 = vmatpush.msra.mxu2 %v1844_v12 }
 0x178   : > { %v1091_v11 = vmul.f32 %v2170_v26, %v1090_v50  ;;  %v1097_v9 = vmul.f32 %v2172_v57, %v3015_v15  ;;  %vm1103_vm9 = vweird.f32 %v2172_v57  ;;  %2131 = vmatpush.msrb.mxu1 %v2782_v34 }
 0x179   : > { %2173 = vrsqrt.f32 %v1071_v54  ;;  %v1184_v40 = vmul.f32 1.442695, %v1176_v48  ;;  %vm1104_vm11 = vmor %vm1102_vm10, %vm1103_vm9  ;;  %vm1112_vm13 = vweird.f32 %v1071_v54  ;;  %1852 = vmatpush.msra.mxu2 %v1843_v20 }
 0x17a   : > { %v1095_v49 = vsel %vm1094_vm8, %v2170_v26, %v1091_v11  ;;  %v1098_v31 = vmul.f32 %v2172_v57, %v1097_v9  ;;  %2132 = vmatpush.msrb.mxu1 %v2793_v38 }
 0x17b   : > { %2175 = vpow2.f32 %v1184_v40  ;;  %v1157_v14 = vmul.f32 %v1095_v49, %v2859_v8  ;;  %v2100_v8 = vld [vmem:[%s3402_s4 + $0x100] sm:$0xff]  ;;  %1853 = vmatpush.msra.mxu2 %v1842_v27 }
 0x17c   : > { %v1099_v10 = vmul.f32 0.5, %v1098_v31  ;;  %1475 = vmatpush.msra.mxu3 %v2100_v8  ;;  %2133 = vmatpush.msrb.mxu1 %v2798_v39 }
 0x17d   : > { %v3074_v41 = vmul.f32 %v3028_v61, %v1157_v14  ;;  %1854 = vmatpush.msra.mxu2 %v1841_v52 }
 0x17e   : > { %v1100_v16 = vsub.f32 1.5, %v1099_v10  ;;  %v1056_v26 = vpop.f32.mrf.mxu0  ;;  %2134 = vmatpush.msrb.mxu1 %v2811_v44  ;;  %2136 = vmatpush.msrb.mxu3 %v1845_v1 }
 0x17f   : > { %v2174_v62 = vpop.eup %2173  ;;  %v3080_v18 = vmax.f32 %v1056_v26, 1e-24  ;;  %v1177_v13 = vsub.f32 0.0, %v3074_v41  ;;  %1855 = vmatpush.msra.mxu2 %v1840_v58 }
 0x180   : > { %v1101_v24 = vmul.f32 %v2172_v57, %v1100_v16  ;;  %v1107_v59 = vmul.f32 %v2174_v62, %v1071_v54  ;;  %vm1113_vm12 = vweird.f32 %v2174_v62  ;;  %2135 = vmatpush.msrb.mxu1 %v2816_v47  ;;  %2137 = vmatpush.msrb.mxu3 %v1844_v12 }
 0x181   : > { %v2176_v22 = vpop.eup %2175  ;;  %2177 = vrsqrt.f32 %v3080_v18  ;;  %v1186_v32 = vmul.f32 1.442695, %v1177_v13  ;;  %vm1114_vm14 = vmor %vm1112_vm13, %vm1113_vm12  ;;  %vm1122_vm1 = vweird.f32 %v3080_v18 }
 0x182   : > { %v1105_v42 = vsel %vm1104_vm11, %v2172_v57, %v1101_v24  ;;  %v1108_v63 = vmul.f32 %v2174_v62, %v1107_v59  ;;  %v1200_v35 = vadd.f32 1.0, %v2176_v22  ;;  %2138 = vmatpush.msrb.mxu3 %v1843_v20 }
 0x183   : > { %2179 = vpow2.f32 %v1186_v32  ;;  %v1158_v56 = vmul.f32 %v1105_v42, %v2866_v4 }
 0x184   : > { %v1109_v23 = vmul.f32 0.5, %v1108_v63  ;;  %2181 = vrcp.f32 %v1200_v35  ;;  %v1217_v10 = vand.u32 2147483647, %v1200_v35  ;;  %v1219_v55 = vand.u32 2147483648, %v1200_v35  ;;  %2139 = vmatpush.msrb.mxu3 %v1842_v27 }
 0x185   : > { %v3090_v15 = vmul.f32 %v3028_v61, %v1158_v56  ;;  %vm1213_vm3 = vweird.f32 %v1200_v35 }
 0x186   : > { %v1110_v60 = vsub.f32 1.5, %v1109_v23  ;;  %v1059_v50 = vpop.f32.mrf.mxu0  ;;  %vm1218_vm5 = vcmp.eq.f32.partialorder %v1217_v10, 8.507059e+37  ;;  %v1220_v47 = vor.u32 1.1754944e-38, %v1219_v55  ;;  %2140 = vmatpush.msrb.mxu3 %v1841_v52 }
 0x187   : > { %v3093_v19 = vpop.eup %2177  ;;  %v3095_v28 = vmax.f32 %v1059_v50, 1e-24  ;;  %v1178_v57 = vsub.f32 0.0, %v3090_v15 }
 0x188   : > { %v1111_v4 = vmul.f32 %v2174_v62, %v1110_v60  ;;  %v1117_v30 = vmul.f32 %v3093_v19, %v3080_v18  ;;  %vm1123_vm15 = vweird.f32 %v3093_v19  ;;  %2141 = vmatpush.msrb.mxu3 %v1840_v58 }
 0x189   : > { %v2180_v6 = vpop.eup %2179  ;;  %2183 = vrsqrt.f32 %v3095_v28  ;;  %v1188_v33 = vmul.f32 1.442695, %v1178_v57  ;;  %vm3121_vm2 = vmor %vm1122_vm1, %vm1123_vm15  ;;  %vm1132_vm8 = vweird.f32 %v3095_v28 }
 0x18a   : > { %v2182_v48 = vpop.eup %2181  ;;  %v1115_v11 = vsel %vm1114_vm14, %v2174_v62, %v1111_v4  ;;  %v1118_v9 = vmul.f32 %v3093_v19, %v1117_v30  ;;  %v3104_v51 = vadd.f32 1.0, %v2180_v6 }
 0x18b   : > { %v1209_v40 = vmul.f32 %v2182_v48, %v1200_v35  ;;  %2185 = vpow2.f32 %v1188_v33  ;;  %v1159_v34 = vmul.f32 %v1115_v11, %v2873_v0  ;;  %vm1214_vm0 = vweird.f32 %v2182_v48 }
 0x18c   : > { %v1119_v54 = vmul.f32 0.5, %v1118_v9  ;;  %2187 = vrcp.f32 %v3104_v51  ;;  %vm1215_vm4 = vmor %vm1213_vm3, %vm1214_vm0  ;;  %v1234_v57 = vand.u32 2147483648, %v3104_v51  ;;  %v1232_v11 = vand.u32 2147483647, %v3104_v51 }
 0x18d   : > { %v1210_v49 = vsub.f32 1.0, %v1209_v40  ;;  %v3110_v31 = vmul.f32 %v3028_v61, %v1159_v34  ;;  %vm1228_vm10 = vweird.f32 %v3104_v51 }
 0x18e   : > { %v1120_v38 = vsub.f32 1.5, %v1119_v54  ;;  %v1062_v14 = vpop.f32.mrf.mxu0  ;;  %v1235_v54 = vor.u32 1.1754944e-38, %v1234_v57  ;;  %vm1233_vm12 = vcmp.eq.f32.partialorder %v1232_v11, 8.507059e+37 }
 0x18f   : > { %v2184_v16 = vpop.eup %2183  ;;  %v3114_v26 = vmax.f32 %v1062_v14, 1e-24  ;;  %v1211_v0 = vmul.f32 %v2182_v48, %v1210_v49  ;;  %v1179_v39 = vsub.f32 0.0, %v3110_v31 }
 0x190   : > { %v1121_v8 = vmul.f32 %v3093_v19, %v1120_v38  ;;  %v1127_v44 = vmul.f32 %v2184_v16, %v3095_v28  ;;  %vm1133_vm6 = vweird.f32 %v2184_v16 }
 0x191   : > { %v2186_v62 = vpop.eup %2185  ;;  %2189 = vrsqrt.f32 %v3114_v26  ;;  %v1212_v24 = vadd.f32 %v2182_v48, %v1211_v0  ;;  %v1190_v59 = vmul.f32 1.442695, %v1179_v39  ;;  %vm1134_vm9 = vmor %vm1132_vm8, %vm1133_vm6  ;;  %vm1142_vm15 = vweird.f32 %v3114_v26 }
 0x192   : > { %v2188_v22 = vpop.eup %2187  ;;  %v1128_v32 = vmul.f32 %v2184_v16, %v1127_v44  ;;  %v3126_v42 = vadd.f32 1.0, %v2186_v62  ;;  %v1125_v18 = vsel %vm3121_vm2, %v3093_v19, %v1121_v8 }
 0x193   : > { %v1216_v63 = vsel %vm1215_vm4, %v2182_v48, %v1212_v24  ;;  %v1224_v56 = vmul.f32 %v2188_v22, %v3104_v51  ;;  %2191 = vpow2.f32 %v1190_v59  ;;  %v1160_v6 = vmul.f32 %v1125_v18, %v2883_v21 }
 0x194   : > { %v1129_v23 = vmul.f32 0.5, %v1128_v32  ;;  %v1221_v60 = vsel %vm1218_vm5, %v1220_v47, %v1216_v63  ;;  %2193 = vrcp.f32 %v3126_v42  ;;  %vm1229_vm7 = vweird.f32 %v2188_v22 }
 0x195   : > { %v1222_v35 = vmul.f32 %v1221_v60, %v3054_v17  ;;  %v1225_v50 = vsub.f32 1.0, %v1224_v56  ;;  %v3145_v40 = vmul.f32 %v3028_v61, %v1160_v6  ;;  %vm1230_vm11 = vmor %vm1228_vm10, %vm1229_vm7  ;;  %v1249_v62 = vand.u32 2147483648, %v3126_v42 }
 0x196   : > { %v1130_v4 = vsub.f32 1.5, %v1129_v23  ;;  %v1065_v30 = vpop.f32.mrf.mxu0  ;;  %v1247_v32 = vand.u32 2147483647, %v3126_v42  ;;  %vm1243_vm1 = vweird.f32 %v3126_v42 }
 0x197   : > { %v3136_v33 = vpop.eup %2189  ;;  %v3138_v19 = vmax.f32 %v1065_v30, 1e-24  ;;  %1377 = vmatmul.f32.vlgmr.msrb.gmra.mxu2 %v1222_v35  ;;  %1421 = vmatmul.f32.gmra.mxu1 %v1222_v35  ;;  %v1226_v48 = vmul.f32 %v2188_v22, %v1225_v50  ;;  %v1180_v10 = vsub.f32 0.0, %v3145_v40  ;;  %v1250_v35 = vor.u32 1.1754944e-38, %v1249_v62 }
 0x198   : > { %v1131_v9 = vmul.f32 %v2184_v16, %v1130_v4  ;;  %v1137_v17 = vmul.f32 %v3136_v33, %v3114_v26  ;;  %vm1143_vm13 = vweird.f32 %v3136_v33  ;;  %vm1248_vm3 = vcmp.eq.f32.partialorder %v1247_v32, 8.507059e+37 }
 0x199   : > { %v2192_v21 = vpop.eup %2191  ;;  %2195 = vrsqrt.f32 %v3138_v19  ;;  %v1227_v34 = vadd.f32 %v2188_v22, %v1226_v48  ;;  %v1192_v24 = vmul.f32 1.442695, %v1180_v10  ;;  %vm1144_vm0 = vmor %vm1142_vm15, %vm1143_vm13  ;;  %vm1152_vm6 = vweird.f32 %v3138_v19 }
 0x19a   : > { %v2194_v49 = vpop.eup %2193  ;;  %v1135_v38 = vsel %vm1134_vm9, %v2184_v16, %v1131_v9  ;;  %v1138_v14 = vmul.f32 %v3136_v33, %v1137_v17  ;;  %v3152_v28 = vadd.f32 1.0, %v2192_v21 }
 0x19b   : > { %v1231_v55 = vsel %vm1230_vm11, %v2188_v22, %v1227_v34  ;;  %v1239_v0 = vmul.f32 %v2194_v49, %v3126_v42  ;;  %v1161_v39 = vmul.f32 %v1135_v38, %v2890_v5  ;;  %vm1244_vm14 = vweird.f32 %v2194_v49 }
 0x19c   : > { %v1139_v8 = vmul.f32 0.5, %v1138_v14  ;;  %v1236_v44 = vsel %vm1233_vm12, %v1235_v54, %v1231_v55  ;;  %2197 = vrcp.f32 %v3152_v28  ;;  %vm1245_vm2 = vmor %vm1243_vm1, %vm1244_vm14  ;;  %v1262_v34 = vand.u32 2147483647, %v3152_v28 }
 0x19d   : > { %v1237_v51 = vmul.f32 %v1236_v44, %v3074_v41  ;;  %v1240_v16 = vsub.f32 1.0, %v1239_v0  ;;  %v3162_v59 = vmul.f32 %v3028_v61, %v1161_v39  ;;  %2199 = vpow2.f32 %v1192_v24 }
 0x19e   : > { %v1140_v13 = vsub.f32 1.5, %v1139_v8  ;;  %vm1258_vm8 = vweird.f32 %v3152_v28  ;;  %vm1263_vm10 = vcmp.eq.f32.partialorder %v1262_v34, 8.507059e+37 }
 0x19f   : > { %v2196_v22 = vpop.eup %2195  ;;  %1380 = vmatmul.f32.gmra.mxu2 %v1237_v51  ;;  %1424 = vmatmul.f32.gmra.mxu1 %v1237_v51  ;;  %v1241_v5 = vmul.f32 %v2194_v49, %v1240_v16  ;;  %v1181_v63 = vsub.f32 0.0, %v3162_v59 }
 0x1a0   : > { %v1141_v47 = vmul.f32 %v3136_v33, %v1140_v13  ;;  %v1147_v41 = vmul.f32 %v2196_v22, %v3138_v19  ;;  %1476 = vmatmul.f32.vlgmr.msra.gmra.mxu3 %v1237_v51  ;;  %vm1153_vm4 = vweird.f32 %v2196_v22 }
 0x1a1   : > { %v1242_v18 = vadd.f32 %v2194_v49, %v1241_v5  ;;  %v1194_v57 = vmul.f32 1.442695, %v1181_v63  ;;  %vm1154_vm7 = vmor %vm1152_vm6, %vm1153_vm4 }
 0x1a2   : > { %v2198_v56 = vpop.eup %2197  ;;  %v1145_v23 = vsel %vm1144_vm0, %v3136_v33, %v1141_v47  ;;  %v1148_v60 = vmul.f32 %v2196_v22, %v1147_v41  ;;  %v1264_v33 = vand.u32 2147483648, %v3152_v28 }
 0x1a3   : > { %v1246_v50 = vsel %vm1245_vm2, %v2194_v49, %v1242_v18  ;;  %v1254_v26 = vmul.f32 %v2198_v56, %v3152_v28  ;;  %v1162_v6 = vmul.f32 %v1145_v23, %v2897_v37  ;;  %2201 = vpow2.f32 %v1194_v57  ;;  %v2200_v11 = vpop.eup %2199 }
 0x1a4   : > { %v1149_v4 = vmul.f32 0.5, %v1148_v60  ;;  %v1251_v30 = vsel %vm1248_vm3, %v1250_v35, %v1246_v50  ;;  %vm1259_vm5 = vweird.f32 %v2198_v56  ;;  %v1204_v54 = vadd.f32 1.0, %v2200_v11 }
 0x1a5   : > { %v1252_v48 = vmul.f32 %v1251_v30, %v3090_v15  ;;  %v1255_v42 = vsub.f32 1.0, %v1254_v26  ;;  %v3176_v17 = vmul.f32 %v3028_v61, %v1162_v6  ;;  %vm1260_vm9 = vmor %vm1258_vm8, %vm1259_vm5  ;;  %v1265_v38 = vor.u32 1.1754944e-38, %v1264_v33 }
 0x1a6   : > { %v1150_v9 = vsub.f32 1.5, %v1149_v4  ;;  %2203 = vrcp.f32 %v1204_v54  ;;  %vm1273_vm12 = vweird.f32 %v1204_v54 }
 0x1a7   : > { %1383 = vmatmul.f32.gmra.mxu2 %v1252_v48  ;;  %1427 = vmatmul.f32.gmra.mxu1 %v1252_v48  ;;  %v1256_v21 = vmul.f32 %v2198_v56, %v1255_v42  ;;  %v1182_v15 = vsub.f32 0.0, %v3176_v17 }
 0x1a8   : > { %v1151_v37 = vmul.f32 %v2196_v22, %v1150_v9  ;;  %1479 = vmatmul.f32.gmra.mxu3 %v1252_v48 }
 0x1a9   : > { %v1257_v49 = vadd.f32 %v2198_v56, %v1256_v21  ;;  %v1196_v14 = vmul.f32 1.442695, %v1182_v15  ;;  %v2202_v55 = vpop.eup %2201 }
 0x1aa   : > { %v1155_v10 = vsel %vm1154_vm7, %v2196_v22, %v1151_v37  ;;  %v1205_v44 = vadd.f32 1.0, %v2202_v55 }
 0x1ab   : > { %v1261_v0 = vsel %vm1260_vm9, %v2198_v56, %v1257_v49  ;;  %v1163_v39 = vmul.f32 %v1155_v10, %v2903_v3  ;;  %2205 = vpow2.f32 %v1196_v14  ;;  %v1279_v3 = vand.u32 2147483648, %v1204_v54 }
 0x1ac   : > { %v1266_v8 = vsel %vm1263_vm10, %v1265_v38, %v1261_v0  ;;  %2207 = vrcp.f32 %v1205_v44  ;;  %v2204_v28 = vpop.eup %2203  ;;  %v1294_v23 = vand.u32 2147483648, %v1205_v44  ;;  %v1292_v26 = vand.u32 2147483647, %v1205_v44 }
 0x1ad   : > { %v1267_v19 = vmul.f32 %v1266_v8, %v3110_v31  ;;  %v3185_v51 = vmul.f32 %v3028_v61, %v1163_v39  ;;  %v1269_v62 = vmul.f32 %v2204_v28, %v1204_v54  ;;  %vm1274_vm11 = vweird.f32 %v2204_v28 }
 0x1ae   : > { %v1277_v31 = vand.u32 2147483647, %v1204_v54  ;;  %vm1275_vm13 = vmor %vm1273_vm12, %vm1274_vm11  ;;  %v1280_v18 = vor.u32 1.1754944e-38, %v1279_v3  ;;  %vm1288_vm0 = vweird.f32 %v1205_v44  ;;  %v1295_v48 = vor.u32 1.1754944e-38, %v1294_v23 }
 0x1af   : > { %1386 = vmatmul.f32.gmra.mxu2 %v1267_v19  ;;  %1430 = vmatmul.f32.gmra.mxu1 %v1267_v19  ;;  %v1183_v16 = vsub.f32 0.0, %v3185_v51  ;;  %v1270_v22 = vsub.f32 1.0, %v1269_v62  ;;  %vm1293_vm2 = vcmp.eq.f32.partialorder %v1292_v26, 8.507059e+37 }
 0x1b0   : > { %1482 = vmatmul.f32.gmra.mxu3 %v1267_v19  ;;  %vm1278_vm14 = vcmp.eq.f32.partialorder %v1277_v31, 8.507059e+37 }
 0x1b1   : > { %v1198_v13 = vmul.f32 1.442695, %v1183_v16  ;;  %v2206_v24 = vpop.eup %2205  ;;  %v1271_v47 = vmul.f32 %v2204_v28, %v1270_v22 }
 0x1b2   : > { %v1206_v5 = vadd.f32 1.0, %v2206_v24  ;;  %v2208_v32 = vpop.eup %2207 }
 0x1b3   : > { %2209 = vpow2.f32 %v1198_v13  ;;  %v1284_v61 = vmul.f32 %v2208_v32, %v1205_v44  ;;  %v1272_v41 = vadd.f32 %v2204_v28, %v1271_v47  ;;  %vm1289_vm15 = vweird.f32 %v2208_v32 }
 0x1b4   : > { %2211 = vrcp.f32 %v1206_v5  ;;  %vm1290_vm1 = vmor %vm1288_vm0, %vm1289_vm15  ;;  %v1309_v21 = vand.u32 2147483648, %v1206_v5  ;;  %vm1303_vm4 = vweird.f32 %v1206_v5 }
 0x1b5   : > { %v1285_v63 = vsub.f32 1.0, %v1284_v61  ;;  %v1276_v56 = vsel %vm1275_vm13, %v2204_v28, %v1272_v41 }
 0x1b6   : > { %v1281_v35 = vsel %vm1278_vm14, %v1280_v18, %v1276_v56  ;;  %v1310_v49 = vor.u32 1.1754944e-38, %v1309_v21 }
 0x1b7   : > { %v1286_v50 = vmul.f32 %v2208_v32, %v1285_v63  ;;  %v1282_v57 = vmul.f32 %v1281_v35, %v3145_v40  ;;  %v1307_v40 = vand.u32 2147483647, %v1206_v5 }
 0x1b9   : > { %v2210_v60 = vpop.eup %2209  ;;  %v1287_v6 = vadd.f32 %v2208_v32, %v1286_v50  ;;  %1389 = vmatmul.f32.gmra.mxu2 %v1282_v57  ;;  %1433 = vmatmul.f32.gmra.mxu1 %v1282_v57  ;;  %vm1308_vm6 = vcmp.eq.f32.partialorder %v1307_v40, 8.507059e+37 }
 0x1ba   : > { %v1207_v4 = vadd.f32 1.0, %v2210_v60  ;;  %v2212_v30 = vpop.eup %2211  ;;  %1485 = vmatmul.f32.gmra.mxu3 %v1282_v57 }
 0x1bb   : > { %v1299_v42 = vmul.f32 %v2212_v30, %v1206_v5  ;;  %v1291_v11 = vsel %vm1290_vm1, %v2208_v32, %v1287_v6  ;;  %vm1304_vm3 = vweird.f32 %v2212_v30  ;;  %v2164_v5 = vld [vmem:[%s3403_s5] ss:$0 sm:$0xff] }
 0x1bc   : > { %2213 = vrcp.f32 %v1207_v4  ;;  %v1296_v9 = vsel %vm1293_vm2, %v1295_v48, %v1291_v11  ;;  %vm1305_vm5 = vmor %vm1303_vm4, %vm1304_vm3  ;;  %v1324_v39 = vand.u32 2147483648, %v1207_v4  ;;  %v1322_v8 = vand.u32 2147483647, %v1207_v4 }
 0x1bd   : > { %v1300_v33 = vsub.f32 1.0, %v1299_v42  ;;  %v1297_v34 = vmul.f32 %v1296_v9, %v3162_v59  ;;  %vm1318_vm8 = vweird.f32 %v1207_v4 }
 0x1be   : > { %v1325_v28 = vor.u32 1.1754944e-38, %v1324_v39  ;;  %vm1323_vm10 = vcmp.eq.f32.partialorder %v1322_v8, 8.507059e+37 }
 0x1bf   : > { %v1301_v54 = vmul.f32 %v2212_v30, %v1300_v33 }
 0x1c1   : > { %v1302_v15 = vadd.f32 %v2212_v30, %v1301_v54  ;;  %1392 = vmatmul.f32.gmra.mxu2 %v1297_v34  ;;  %1436 = vmatmul.f32.gmra.mxu1 %v1297_v34 }
 0x1c2   : > { %v2214_v37 = vpop.eup %2213  ;;  %1488 = vmatmul.f32.gmra.mxu3 %v1297_v34 }
 0x1c3   : > { %v1314_v38 = vmul.f32 %v2214_v37, %v1207_v4  ;;  %v1306_v14 = vsel %vm1305_vm5, %v2212_v30, %v1302_v15  ;;  %vm1319_vm7 = vweird.f32 %v2214_v37 }
 0x1c4   : > { %v1311_v10 = vsel %vm1308_vm6, %v1310_v49, %v1306_v14  ;;  %vm1320_vm9 = vmor %vm1318_vm8, %vm1319_vm7 }
 0x1c5   : > { %v1315_v55 = vsub.f32 1.0, %v1314_v38  ;;  %v1312_v59 = vmul.f32 %v1311_v10, %v3176_v17 }
 0x1c7   : > { %v1316_v0 = vmul.f32 %v2214_v37, %v1315_v55 }
 0x1c9   : > { %v1317_v44 = vadd.f32 %v2214_v37, %v1316_v0  ;;  %1395 = vmatmul.f32.gmra.mxu2 %v1312_v59  ;;  %1439 = vmatmul.f32.gmra.mxu1 %v1312_v59 }
 0x1ca   : > { %1491 = vmatmul.f32.gmra.mxu3 %v1312_v59 }
 0x1cb   : > { %v1321_v19 = vsel %vm1320_vm9, %v2214_v37, %v1317_v44 }
 0x1cc   : > { %v1326_v16 = vsel %vm1323_vm10, %v1325_v28, %v1321_v19 }
 0x1cd   : > { %v1327_v62 = vmul.f32 %v1326_v16, %v3185_v51 }
 0x1d1   : > { %1398 = vmatmul.f32.gmra.mxu2 %v1327_v62 }
 0x1d2   : > { %1494 = vmatmul.f32.gmra.mxu3 %v1327_v62 }
 0x1da   : > { %1497 = vmatmul.f32.gmra.mxu3 %v2271_v53 }
 0x1de   : > { %v1419_v13 = vpop.f32.mrf.mxu1 }
 0x214   : > { %v1422_v17 = vpop.f32.mrf.mxu1 }
 0x21a   : > { %v1378_v24 = vpop.f32.mrf.mxu2 }
 0x21b   : > { %v1420_v22 = vadd.f32 %v1419_v13, %v1378_v24 }
 0x21c   : > { %v1425_v18 = vpop.f32.mrf.mxu1 }
 0x222   : > { %v1381_v3 = vpop.f32.mrf.mxu2 }
 0x223   : > { %v1477_v32 = vpop.f32.mrf.mxu3  ;;  %v1423_v61 = vadd.f32 %v1422_v17, %v1381_v3 }
 0x224   : > { %v1501_v47 = vadd.f32 %v1477_v32, %v1420_v22  ;;  %v1428_v57 = vpop.f32.mrf.mxu1 }
 0x226   : > { %v3196_v31 = vadd.f32 %v2164_v5, %v1501_v47 }
 0x228   : > { %v1521_v51 = vmul.f32 %v3196_v31, %v3196_v31 }
 0x22a   : > { %1545 = vmatmul.f32.vlgmr.msra.gmra.mxu0 %v1521_v51  ;;  %v1384_v41 = vpop.f32.mrf.mxu2 }
 0x22b   : > { %v1480_v53 = vpop.f32.mrf.mxu3  ;;  %v1426_v60 = vadd.f32 %v1425_v18, %v1384_v41 }
 0x22c   : > { %v1502_v63 = vadd.f32 %v1480_v53, %v1423_v61  ;;  %v1431_v42 = vpop.f32.mrf.mxu1  ;;  %v1838_v61 = vld [vmem:[%s3405_s7 + $0x40] sm:$0xff]  ;;  %v1837_v53 = vld [vmem:[%s3405_s7 + $0x38] sm:$0xff] }
 0x22e   : > { %v3200_v56 = vadd.f32 %v2164_v5, %v1502_v63 }
 0x230   : > { %v1522_v23 = vmul.f32 %v3200_v56, %v3200_v56 }
 0x232   : > { %1548 = vmatmul.f32.gmra.mxu0 %v1522_v23  ;;  %v1387_v26 = vpop.f32.mrf.mxu2  ;;  %v1836_v23 = vld [vmem:[%s3405_s7 + $0x30] sm:$0xff] }
 0x233   : > { %v1483_v35 = vpop.f32.mrf.mxu3  ;;  %v1429_v6 = vadd.f32 %v1428_v57, %v1387_v26  ;;  %v1835_v57 = vld [vmem:[%s3405_s7 + $0x28] sm:$0xff] }
 0x234   : > { %v1503_v50 = vadd.f32 %v1483_v35, %v1426_v60 }
 0x236   : > { %v3204_v4 = vadd.f32 %v2164_v5, %v1503_v50  ;;  %v1434_v15 = vpop.f32.mrf.mxu1 }
 0x238   : > { %v1523_v30 = vmul.f32 %v3204_v4, %v3204_v4 }
 0x23a   : > { %1551 = vmatmul.f32.gmra.mxu0 %v1523_v30  ;;  %v3280_v30 = vld [vmem:[%s3404_s6] ss:$0 sm:$0xff] }
 0x23c   : > { %v1390_v48 = vpop.f32.mrf.mxu2 }
 0x23d   : > { %v1486_v11 = vpop.f32.mrf.mxu3  ;;  %v1432_v34 = vadd.f32 %v1431_v42, %v1390_v48  ;;  %v1834_v42 = vld [vmem:[%s3405_s7 + $0x20] sm:$0xff] }
 0x23e   : > { %v1504_v9 = vadd.f32 %v1486_v11, %v1429_v6  ;;  %v1437_v59 = vpop.f32.mrf.mxu1 }
 0x240   : > { %v3208_v33 = vadd.f32 %v2164_v5, %v1504_v9 }
 0x242   : > { %v1524_v21 = vmul.f32 %v3208_v33, %v3208_v33 }
 0x244   : > { %1554 = vmatmul.f32.gmra.mxu0 %v1524_v21  ;;  %v1393_v54 = vpop.f32.mrf.mxu2  ;;  %v1833_v21 = vld [vmem:[%s3405_s7 + $0x18] sm:$0xff] }
 0x245   : > { %v1489_v40 = vpop.f32.mrf.mxu3  ;;  %v1435_v14 = vadd.f32 %v1434_v15, %v1393_v54 }
 0x246   : > { %v1505_v37 = vadd.f32 %v1489_v40, %v1432_v34  ;;  %v1440_v24 = vpop.f32.mrf.mxu1  ;;  %v1832_v40 = vld [vmem:[%s3405_s7 + $0x10] sm:$0xff] }
 0x248   : > { %v3212_v49 = vadd.f32 %v2164_v5, %v1505_v37 }
 0x24a   : > { %v1525_v38 = vmul.f32 %v3212_v49, %v3212_v49 }
 0x24c   : > { %1557 = vmatmul.f32.gmra.mxu0 %v1525_v38  ;;  %v1396_v0 = vpop.f32.mrf.mxu2 }
 0x24d   : > { %v1492_v10 = vpop.f32.mrf.mxu3  ;;  %v1438_v44 = vadd.f32 %v1437_v59, %v1396_v0  ;;  %v1830_v0 = vld [vmem:[%s3405_s7] sm:$0xff] }
 0x24e   : > { %v1506_v55 = vadd.f32 %v1492_v10, %v1435_v14  ;;  %v1831_v14 = vld [vmem:[%s3405_s7 + $0x8] sm:$0xff] }
 0x250   : > { %v3216_v39 = vadd.f32 %v2164_v5, %v1506_v55 }
 0x252   : > { %v1526_v8 = vmul.f32 %v3216_v39, %v3216_v39 }
 0x254   : > { %1560 = vmatmul.f32.gmra.mxu0 %v1526_v8  ;;  %v1399_v62 = vpop.f32.mrf.mxu2 }
 0x255   : > { %v1495_v19 = vpop.f32.mrf.mxu3  ;;  %v1441_v17 = vadd.f32 %v1440_v24, %v1399_v62 }
 0x256   : > { %v1507_v28 = vadd.f32 %v1495_v19, %v1438_v44 }
 0x258   : > { %v3220_v16 = vadd.f32 %v2164_v5, %v1507_v28 }
 0x25a   : > { %v1527_v13 = vmul.f32 %v3220_v16, %v3220_v16 }
 0x25c   : > { %1563 = vmatmul.f32.gmra.mxu0 %v1527_v13 }
 0x25d   : > { %v1498_v22 = vpop.f32.mrf.mxu3 }
 0x25e   : > { %v1508_v3 = vadd.f32 %v1498_v22, %v1441_v17 }
 0x260   : > { %v3224_v32 = vadd.f32 %v2164_v5, %v1508_v3  ;;  %v1839_v5 = vld [vmem:[%s3405_s7 + $0x48] sm:$0xff] }
 0x261   : > { %1856 = vmatpush.msra.mxu2 %v1839_v5  ;;  %2142 = vmatpush.msrb.mxu3 %v1839_v5 }
 0x262   : > { %v1528_v47 = vmul.f32 %v3224_v32, %v3224_v32 }
 0x263   : > { %1857 = vmatpush.msra.mxu2 %v1838_v61  ;;  %2143 = vmatpush.msrb.mxu3 %v1838_v61 }
 0x264   : > { %1566 = vmatmul.f32.vlgmr.msrb.gmra.mxu1 %v1528_v47 }
 0x265   : > { %1858 = vmatpush.msra.mxu2 %v1837_v53  ;;  %2144 = vmatpush.msrb.mxu3 %v1837_v53 }
 0x267   : > { %1859 = vmatpush.msra.mxu2 %v1836_v23  ;;  %2145 = vmatpush.msrb.mxu3 %v1836_v23 }
 0x269   : > { %1860 = vmatpush.msra.mxu2 %v1835_v57  ;;  %2146 = vmatpush.msrb.mxu3 %v1835_v57 }
 0x26b   : > { %1861 = vmatpush.msra.mxu2 %v1834_v42  ;;  %2147 = vmatpush.msrb.mxu3 %v1834_v42 }
 0x26d   : > { %1862 = vmatpush.msra.mxu2 %v1833_v21  ;;  %2148 = vmatpush.msrb.mxu3 %v1833_v21 }
 0x26f   : > { %1863 = vmatpush.msra.mxu2 %v1832_v40  ;;  %2149 = vmatpush.msrb.mxu3 %v1832_v40 }
 0x271   : > { %1864 = vmatpush.msra.mxu2 %v1831_v14  ;;  %2150 = vmatpush.msrb.mxu3 %v1831_v14 }
 0x273   : > { %1865 = vmatpush.msra.mxu2 %v1830_v0  ;;  %2151 = vmatpush.msrb.mxu3 %v1830_v0 }
 0x2a7   : > { %v1546_v36 = vpop.f32.mrf.mxu0 }
 0x2a8   : > { %v1570_v43 = vmax.f32 %v1546_v36, 1e-24 }
 0x2aa   : > { %2215 = vrsqrt.f32 %v1570_v43  ;;  %vm1584_vm12 = vweird.f32 %v1570_v43 }
 0x2af   : > { %v1549_v2 = vpop.f32.mrf.mxu0 }
 0x2b0   : > { %v2216_v7 = vpop.eup %2215  ;;  %v1571_v25 = vmax.f32 %v1549_v2, 1e-24 }
 0x2b1   : > { %v1579_v46 = vmul.f32 %v2216_v7, %v1570_v43  ;;  %vm1585_vm11 = vweird.f32 %v2216_v7 }
 0x2b2   : > { %2217 = vrsqrt.f32 %v1571_v25  ;;  %vm1586_vm13 = vmor %vm1584_vm12, %vm1585_vm11  ;;  %vm1594_vm15 = vweird.f32 %v1571_v25 }
 0x2b3   : > { %v1580_v51 = vmul.f32 %v2216_v7, %v1579_v46 }
 0x2b5   : > { %v1581_v41 = vmul.f32 0.5, %v1580_v51 }
 0x2b7   : > { %v1582_v18 = vsub.f32 1.5, %v1581_v41  ;;  %v1552_v63 = vpop.f32.mrf.mxu0 }
 0x2b8   : > { %v2218_v60 = vpop.eup %2217  ;;  %v1572_v35 = vmax.f32 %v1552_v63, 1e-24 }
 0x2b9   : > { %v1583_v50 = vmul.f32 %v2216_v7, %v1582_v18  ;;  %v1589_v26 = vmul.f32 %v2218_v60, %v1571_v25  ;;  %vm1595_vm14 = vweird.f32 %v2218_v60 }
 0x2ba   : > { %2219 = vrsqrt.f32 %v1572_v35  ;;  %vm1596_vm0 = vmor %vm1594_vm15, %vm1595_vm14  ;;  %vm1604_vm2 = vweird.f32 %v1572_v35 }
 0x2bb   : > { %v1587_v6 = vsel %vm1586_vm13, %v2216_v7, %v1583_v50  ;;  %v1590_v48 = vmul.f32 %v2218_v60, %v1589_v26 }
 0x2bc   : > { %v1658_v11 = vmul.f32 %v1587_v6, %v3196_v31 }
 0x2bd   : > { %v1591_v9 = vmul.f32 0.5, %v1590_v48 }
 0x2be   : > { %v3290_v34 = vmul.f32 %v3280_v30, %v1658_v11 }
 0x2bf   : > { %v1592_v54 = vsub.f32 1.5, %v1591_v9 }
 0x2c0   : > { %v2220_v37 = vpop.eup %2219  ;;  %v1678_v31 = vsub.f32 0.0, %v3290_v34 }
 0x2c1   : > { %v1593_v15 = vmul.f32 %v2218_v60, %v1592_v54  ;;  %v1599_v38 = vmul.f32 %v2220_v37, %v1572_v35  ;;  %v1555_v8 = vpop.f32.mrf.mxu0  ;;  %vm1605_vm1 = vweird.f32 %v2220_v37 }
 0x2c2   : > { %v1686_v10 = vmul.f32 1.442695, %v1678_v31  ;;  %v1573_v28 = vmax.f32 %v1555_v8, 1e-24  ;;  %vm1606_vm3 = vmor %vm1604_vm2, %vm1605_vm1 }
 0x2c3   : > { %v1600_v55 = vmul.f32 %v2220_v37, %v1599_v38  ;;  %v1597_v59 = vsel %vm1596_vm0, %v2218_v60, %v1593_v15 }
 0x2c4   : > { %2221 = vpow2.f32 %v1686_v10  ;;  %v1659_v44 = vmul.f32 %v1597_v59, %v3200_v56  ;;  %vm1614_vm5 = vweird.f32 %v1573_v28 }
 0x2c5   : > { %v1601_v19 = vmul.f32 0.5, %v1600_v55  ;;  %2223 = vrsqrt.f32 %v1573_v28 }
 0x2c6   : > { %v3304_v62 = vmul.f32 %v3280_v30, %v1659_v44 }
 0x2c7   : > { %v1602_v13 = vsub.f32 1.5, %v1601_v19 }
 0x2c8   : > { %v1679_v24 = vsub.f32 0.0, %v3304_v62 }
 0x2c9   : > { %v1603_v17 = vmul.f32 %v2220_v37, %v1602_v13  ;;  %v1558_v45 = vpop.f32.mrf.mxu0 }
 0x2ca   : > { %v2222_v22 = vpop.eup %2221  ;;  %v1688_v3 = vmul.f32 1.442695, %v1679_v24  ;;  %v1574_v12 = vmax.f32 %v1558_v45, 1e-24 }
 0x2cb   : > { %v1702_v47 = vadd.f32 1.0, %v2222_v22  ;;  %v1607_v29 = vsel %vm1606_vm3, %v2220_v37, %v1603_v17  ;;  %v2224_v1 = vpop.eup %2223 }
 0x2cc   : > { %2225 = vpow2.f32 %v1688_v3  ;;  %v1660_v56 = vmul.f32 %v1607_v29, %v3204_v4  ;;  %v1609_v20 = vmul.f32 %v2224_v1, %v1573_v28  ;;  %vm1615_vm4 = vweird.f32 %v2224_v1 }
 0x2cd   : > { %2227 = vrcp.f32 %v1702_v47  ;;  %vm1616_vm6 = vmor %vm1614_vm5, %vm1615_vm4  ;;  %v1719_v63 = vand.u32 2147483647, %v1702_v47  ;;  %v1721_v23 = vand.u32 2147483648, %v1702_v47  ;;  %vm1715_vm8 = vweird.f32 %v1702_v47 }
 0x2ce   : > { %v3309_v27 = vmul.f32 %v3280_v30, %v1660_v56  ;;  %2229 = vrsqrt.f32 %v1574_v12  ;;  %v1610_v36 = vmul.f32 %v2224_v1, %v1609_v20  ;;  %vm1624_vm12 = vweird.f32 %v1574_v12 }
 0x2cf   : > { %vm1720_vm11 = vcmp.eq.f32.partialorder %v1719_v63, 8.507059e+37  ;;  %v1722_v11 = vor.u32 1.1754944e-38, %v1721_v23 }
 0x2d0   : > { %v1680_v43 = vsub.f32 0.0, %v3309_v27  ;;  %v1611_v58 = vmul.f32 0.5, %v1610_v36 }
 0x2d1   : > { %v1561_v4 = vpop.f32.mrf.mxu0 }
 0x2d2   : > { %v2226_v52 = vpop.eup %2225  ;;  %v1690_v2 = vmul.f32 1.442695, %v1680_v43  ;;  %v1612_v46 = vsub.f32 1.5, %v1611_v58  ;;  %v3314_v61 = vmax.f32 %v1561_v4, 1e-24 }
 0x2d3   : > { %v2228_v7 = vpop.eup %2227  ;;  %v3312_v25 = vadd.f32 1.0, %v2226_v52 }
 0x2d4   : > { %v1711_v5 = vmul.f32 %v2228_v7, %v1702_v47  ;;  %2231 = vpow2.f32 %v1690_v2  ;;  %v2230_v51 = vpop.eup %2229  ;;  %v1613_v41 = vmul.f32 %v2224_v1, %v1612_v46  ;;  %vm1716_vm7 = vweird.f32 %v2228_v7 }
 0x2d5   : > { %2233 = vrcp.f32 %v3312_v25  ;;  %v1619_v53 = vmul.f32 %v2230_v51, %v1574_v12  ;;  %vm1625_vm9 = vweird.f32 %v2230_v51  ;;  %vm1717_vm10 = vmor %vm1715_vm8, %vm1716_vm7  ;;  %v1736_v59 = vand.u32 2147483648, %v3312_v25 }
 0x2d6   : > { %v1712_v18 = vsub.f32 1.0, %v1711_v5  ;;  %2235 = vrsqrt.f32 %v3314_v61  ;;  %v1617_v50 = vsel %vm1616_vm6, %v2224_v1, %v1613_v41  ;;  %vm1626_vm13 = vmor %vm1624_vm12, %vm1625_vm9  ;;  %v1734_v13 = vand.u32 2147483647, %v3312_v25 }
 0x2d7   : > { %v1620_v60 = vmul.f32 %v2230_v51, %v1619_v53  ;;  %v1661_v26 = vmul.f32 %v1617_v50, %v3208_v33  ;;  %vm1730_vm15 = vweird.f32 %v3312_v25  ;;  %v1737_v47 = vor.u32 1.1754944e-38, %v1736_v59 }
 0x2d8   : > { %v1713_v35 = vmul.f32 %v2228_v7, %v1712_v18  ;;  %vm1735_vm2 = vcmp.eq.f32.partialorder %v1734_v13, 8.507059e+37  ;;  %vm1634_vm3 = vweird.f32 %v3314_v61 }
 0x2d9   : > { %v1621_v6 = vmul.f32 0.5, %v1620_v60  ;;  %v1564_v54 = vpop.f32.mrf.mxu0  ;;  %v3323_v31 = vmul.f32 %v3280_v30, %v1661_v26 }
 0x2da   : > { %v2232_v57 = vpop.eup %2231  ;;  %v1714_v48 = vadd.f32 %v2228_v7, %v1713_v35  ;;  %v3325_v15 = vmax.f32 %v1564_v54, 1e-24 }
 0x2db   : > { %v2234_v42 = vpop.eup %2233  ;;  %v3319_v9 = vadd.f32 1.0, %v2232_v57  ;;  %v1622_v21 = vsub.f32 1.5, %v1621_v6  ;;  %v1681_v44 = vsub.f32 0.0, %v3323_v31 }
 0x2dc   : > { %v1718_v40 = vsel %vm1717_vm10, %v2228_v7, %v1714_v48  ;;  %v1726_v37 = vmul.f32 %v2234_v42, %v3312_v25  ;;  %v2236_v33 = vpop.eup %2235  ;;  %vm1731_vm14 = vweird.f32 %v2234_v42  ;;  %vm1644_vm10 = vweird.f32 %v3325_v15 }
 0x2dd   : > { %v1723_v38 = vsel %vm1720_vm11, %v1722_v11, %v1718_v40  ;;  %2237 = vrcp.f32 %v3319_v9  ;;  %v1623_v14 = vmul.f32 %v2230_v51, %v1622_v21  ;;  %v1629_v10 = vmul.f32 %v2236_v33, %v3314_v61  ;;  %vm1732_vm1 = vmor %vm1730_vm15, %vm1731_vm14 }
 0x2de   : > { %v1724_v55 = vmul.f32 %v1723_v38, %v3290_v34  ;;  %2239 = vrsqrt.f32 %v3325_v15  ;;  %v1727_v0 = vsub.f32 1.0, %v1726_v37  ;;  %v1692_v34 = vmul.f32 1.442695, %v1681_v44 }
 0x2df   : > { %v1630_v8 = vmul.f32 %v2236_v33, %v1629_v10  ;;  %v1627_v19 = vsel %vm1626_vm13, %v2230_v51, %v1623_v14  ;;  %vm1635_vm0 = vweird.f32 %v2236_v33  ;;  %v1751_v46 = vand.u32 2147483648, %v3319_v9 }
 0x2e0   : > { %1866 = vmatmul.f32.vlgmr.msra.gmra.mxu2 %v1724_v55  ;;  %v1728_v28 = vmul.f32 %v2234_v42, %v1727_v0  ;;  %v1662_v24 = vmul.f32 %v1627_v19, %v3212_v49  ;;  %2241 = vpow2.f32 %v1692_v34  ;;  %vm1636_vm4 = vmor %vm1634_vm3, %vm1635_vm0  ;;  %v1749_v41 = vand.u32 2147483647, %v3319_v9 }
 0x2e1   : > { %v1631_v17 = vmul.f32 0.5, %v1630_v8  ;;  %v1567_v56 = vpop.f32.mrf.mxu1  ;;  %vm1745_vm6 = vweird.f32 %v3319_v9  ;;  %v1752_v35 = vor.u32 1.1754944e-38, %v1751_v46 }
 0x2e2   : > { %v1729_v3 = vadd.f32 %v2234_v42, %v1728_v28  ;;  %v3338_v29 = vmul.f32 %v3280_v30, %v1662_v24  ;;  %v1577_v20 = vmax.f32 %v1567_v56, 1e-24  ;;  %vm1750_vm9 = vcmp.eq.f32.partialorder %v1749_v41, 8.507059e+37 }
 0x2e3   : > { %v2238_v22 = vpop.eup %2237  ;;  %v1632_v45 = vsub.f32 1.5, %v1631_v17 }
 0x2e4   : > { %v1741_v1 = vmul.f32 %v2238_v22, %v3319_v9  ;;  %v2240_v12 = vpop.eup %2239  ;;  %v1733_v49 = vsel %vm1732_vm1, %v2234_v42, %v1729_v3  ;;  %v1682_v36 = vsub.f32 0.0, %v3338_v29  ;;  %2243 = vrsqrt.f32 %v1577_v20 }
 0x2e5   : > { %v1633_v43 = vmul.f32 %v2236_v33, %v1632_v45  ;;  %v1639_v52 = vmul.f32 %v2240_v12, %v3325_v15  ;;  %v1738_v58 = vsel %vm1735_vm2, %v1737_v47, %v1733_v49  ;;  %vm1746_vm5 = vweird.f32 %v2238_v22 }
 0x2e6   : > { %v1739_v2 = vmul.f32 %v1738_v58, %v3304_v62  ;;  %v1742_v7 = vsub.f32 1.0, %v1741_v1  ;;  %v1694_v4 = vmul.f32 1.442695, %v1682_v36  ;;  %v2242_v53 = vpop.eup %2241  ;;  %vm1645_vm7 = vweird.f32 %v2240_v12  ;;  %vm1747_vm8 = vmor %vm1745_vm6, %vm1746_vm5 }
 0x2e7   : > { %v1640_v25 = vmul.f32 %v2240_v12, %v1639_v52  ;;  %v1637_v5 = vsel %vm1636_vm4, %v2236_v33, %v1633_v43  ;;  %v1705_v62 = vadd.f32 1.0, %v2242_v53  ;;  %vm1646_vm11 = vmor %vm1644_vm10, %vm1645_vm7  ;;  %vm1654_vm13 = vweird.f32 %v1577_v20 }
 0x2e8   : > { %1869 = vmatmul.f32.gmra.mxu2 %v1739_v2  ;;  %v1743_v51 = vmul.f32 %v2238_v22, %v1742_v7  ;;  %v1663_v61 = vmul.f32 %v1637_v5, %v3216_v39  ;;  %2245 = vpow2.f32 %v1694_v4 }
 0x2e9   : > { %v1641_v18 = vmul.f32 0.5, %v1640_v25  ;;  %2247 = vrcp.f32 %v1705_v62  ;;  %v1766_v0 = vand.u32 2147483648, %v1705_v62  ;;  %vm1760_vm0 = vweird.f32 %v1705_v62 }
 0x2ea   : > { %v1744_v63 = vadd.f32 %v2238_v22, %v1743_v51  ;;  %v3350_v23 = vmul.f32 %v3280_v30, %v1663_v61  ;;  %v2244_v50 = vpop.eup %2243 }
 0x2eb   : > { %v1642_v60 = vsub.f32 1.5, %v1641_v18  ;;  %v1649_v39 = vmul.f32 %v2244_v50, %v1577_v20  ;;  %vm1655_vm12 = vweird.f32 %v2244_v50  ;;  %v1767_v3 = vor.u32 1.1754944e-38, %v1766_v0 }
 0x2ec   : > { %v1748_v26 = vsel %vm1747_vm8, %v2238_v22, %v1744_v63  ;;  %v1683_v42 = vsub.f32 0.0, %v3350_v23  ;;  %vm1656_vm14 = vmor %vm1654_vm13, %vm1655_vm12 }
 0x2ed   : > { %v1643_v57 = vmul.f32 %v2240_v12, %v1642_v60  ;;  %v1753_v6 = vsel %vm1750_vm9, %v1752_v35, %v1748_v26  ;;  %v1650_v9 = vmul.f32 %v2244_v50, %v1649_v39 }
 0x2ee   : > { %v1754_v48 = vmul.f32 %v1753_v6, %v3309_v27  ;;  %v2246_v11 = vpop.eup %2245  ;;  %v1696_v40 = vmul.f32 1.442695, %v1683_v42 }
 0x2ef   : > { %v1647_v21 = vsel %vm1646_vm11, %v2240_v12, %v1643_v57  ;;  %v1706_v54 = vadd.f32 1.0, %v2246_v11  ;;  %v1651_v33 = vmul.f32 0.5, %v1650_v9  ;;  %v2248_v38 = vpop.eup %2247 }
 0x2f0   : > { %1872 = vmatmul.f32.gmra.mxu2 %v1754_v48  ;;  %v1664_v37 = vmul.f32 %v1647_v21, %v3220_v16  ;;  %v1756_v15 = vmul.f32 %v2248_v38, %v1705_v62  ;;  %vm1761_vm15 = vweird.f32 %v2248_v38  ;;  %v1764_v16 = vand.u32 2147483647, %v1705_v62 }
 0x2f1   : > { %2249 = vrcp.f32 %v1706_v54  ;;  %v1652_v14 = vsub.f32 1.5, %v1651_v33  ;;  %vm1762_vm1 = vmor %vm1760_vm0, %vm1761_vm15  ;;  %v1781_v20 = vand.u32 2147483648, %v1706_v54  ;;  %v1779_v36 = vand.u32 2147483647, %v1706_v54 }
 0x2f2   : > { %2251 = vpow2.f32 %v1696_v40  ;;  %v3357_v10 = vmul.f32 %v3280_v30, %v1664_v37  ;;  %v1757_v55 = vsub.f32 1.0, %v1756_v15  ;;  %vm1765_vm2 = vcmp.eq.f32.partialorder %v1764_v16, 8.507059e+37 }
 0x2f3   : > { %v1653_v27 = vmul.f32 %v2244_v50, %v1652_v14  ;;  %vm1775_vm4 = vweird.f32 %v1706_v54  ;;  %v1782_v58 = vor.u32 1.1754944e-38, %v1781_v20  ;;  %vm1780_vm6 = vcmp.eq.f32.partialorder %v1779_v36, 8.507059e+37 }
 0x2f4   : > { %v1684_v59 = vsub.f32 0.0, %v3357_v10  ;;  %v1758_v44 = vmul.f32 %v2248_v38, %v1757_v55 }
 0x2f5   : > { %v1657_v8 = vsel %vm1656_vm14, %v2244_v50, %v1653_v27 }
 0x2f6   : > { %v1665_v28 = vmul.f32 %v1657_v8, %v3224_v32  ;;  %v1698_v13 = vmul.f32 1.442695, %v1684_v59  ;;  %v1759_v17 = vadd.f32 %v2248_v38, %v1758_v44  ;;  %v1892_v8 = vpop.permute.xlu0 %1891  ;;  %v1896_v44 = vpop.permute.xlu1 %1895 }
 0x2f7   : > { %v2250_v19 = vpop.eup %2249 }
 0x2f8   : > { %v2252_v24 = vpop.eup %2251  ;;  %v1771_v34 = vmul.f32 %v2250_v19, %v1706_v54  ;;  %v3362_v22 = vmul.f32 %v3280_v30, %v1665_v28  ;;  %2253 = vpow2.f32 %v1698_v13  ;;  %v1763_v45 = vsel %vm1762_vm1, %v2248_v38, %v1759_v17  ;;  %v1900_v17 = vpop.permute.xlu2 %1899 }
 0x2f9   : > { %v1707_v47 = vadd.f32 1.0, %v2252_v24  ;;  %v1768_v12 = vsel %vm1765_vm2, %v1767_v3, %v1763_v45  ;;  %vm1776_vm3 = vweird.f32 %v2250_v19 }
 0x2fa   : > { %v1772_v56 = vsub.f32 1.0, %v1771_v34  ;;  %v1685_v1 = vsub.f32 0.0, %v3362_v22  ;;  %v1769_v32 = vmul.f32 %v1768_v12, %v3323_v31  ;;  %vm1777_vm5 = vmor %vm1775_vm4, %vm1776_vm3  ;;  %vm1923_vm3 = vcmask 916480  }
 0x2fb   : > { %2255 = vrcp.f32 %v1707_v47  ;;  %v1796_v41 = vand.u32 2147483648, %v1707_v47  ;;  %v1794_v18 = vand.u32 2147483647, %v1707_v47  ;;  %vm1790_vm8 = vweird.f32 %v1707_v47 }
 0x2fc   : > { %v1773_v49 = vmul.f32 %v2250_v19, %v1772_v56  ;;  %v1700_v43 = vmul.f32 1.442695, %v1685_v1  ;;  %1875 = vmatmul.f32.gmra.mxu2 %v1769_v32 }
 0x2fd   : > { %v1797_v60 = vor.u32 1.1754944e-38, %v1796_v41  ;;  %vm1795_vm10 = vcmp.eq.f32.partialorder %v1794_v18, 8.507059e+37 }
 0x2fe   : > { %v1774_v30 = vadd.f32 %v2250_v19, %v1773_v49  ;;  %v2254_v52 = vpop.eup %2253  ;;  %2257 = vpow2.f32 %v1700_v43  ;;  %v1894_v16 = vpop.permute.xlu0 %1893 }
 0x2ff   : > { %v1708_v7 = vadd.f32 1.0, %v2254_v52  ;;  %v1924_v28 = vsel %vm1923_vm3, %v1892_v8, %v1894_v16  ;;  %v1898_v34 = vpop.permute.xlu1 %1897 }
 0x300   : > { %v1778_v2 = vsel %vm1777_vm5, %v2250_v19, %v1774_v30  ;;  %v1925_v3 = vsel %vm1923_vm3, %v1896_v44, %v1898_v34  ;;  %v1902_v56 = vpop.permute.xlu2 %1901 }
 0x301   : > { %v2256_v25 = vpop.eup %2255  ;;  %v1783_v46 = vsel %vm1780_vm6, %v1782_v58, %v1778_v2  ;;  %2259 = vrcp.f32 %v1708_v7  ;;  %v1811_v39 = vand.u32 2147483648, %v1708_v7  ;;  %v1809_v48 = vand.u32 2147483647, %v1708_v7 }
 0x302   : > { %v1784_v4 = vmul.f32 %v1783_v46, %v3338_v29  ;;  %v1786_v5 = vmul.f32 %v2256_v25, %v1707_v47  ;;  %vm1791_vm7 = vweird.f32 %v2256_v25  ;;  %vm1805_vm12 = vweird.f32 %v1708_v7 }
 0x303   : > { %vm1792_vm9 = vmor %vm1790_vm8, %vm1791_vm7  ;;  %v1812_v21 = vor.u32 1.1754944e-38, %v1811_v39  ;;  %vm1810_vm14 = vcmp.eq.f32.partialorder %v1809_v48, 8.507059e+37  ;;  %v1926_v12 = vsel %vm1923_vm3, %v1900_v17, %v1902_v56 }
 0x304   : > { %v1787_v31 = vsub.f32 1.0, %v1786_v5  ;;  %v2258_v51 = vpop.eup %2257  ;;  %1878 = vmatmul.f32.gmra.mxu2 %v1784_v4 }
 0x305   : > { %v1709_v61 = vadd.f32 1.0, %v2258_v51 }
 0x306   : > { %v1788_v53 = vmul.f32 %v2256_v25, %v1787_v31  ;;  %v1904_v49 = vpop.permute.xlu0 %1903 }
 0x307   : > { %v2260_v63 = vpop.eup %2259  ;;  %2261 = vrcp.f32 %v1709_v61  ;;  %v1826_v33 = vand.u32 2147483648, %v1709_v61  ;;  %vm1820_vm0 = vweird.f32 %v1709_v61  ;;  %v1906_v36 = vpop.permute.xlu1 %1905 }
 0x308   : > { %v1789_v62 = vadd.f32 %v2256_v25, %v1788_v53  ;;  %v1801_v35 = vmul.f32 %v2260_v63, %v1708_v7  ;;  %vm1806_vm11 = vweird.f32 %v2260_v63  ;;  %v1927_v30 = vsel %vm1923_vm3, %v1904_v49, %v1906_v36  ;;  %v1908_v2 = vpop.permute.xlu2 %1907 }
 0x309   : > { %vm1807_vm13 = vmor %vm1805_vm12, %vm1806_vm11  ;;  %v1827_v27 = vor.u32 1.1754944e-38, %v1826_v33 }
 0x30a   : > { %v1793_v50 = vsel %vm1792_vm9, %v2256_v25, %v1789_v62  ;;  %v1802_v26 = vsub.f32 1.0, %v1801_v35 }
 0x30b   : > { %v1798_v29 = vsel %vm1795_vm10, %v1797_v60, %v1793_v50 }
 0x30c   : > { %v1799_v57 = vmul.f32 %v1798_v29, %v3350_v23  ;;  %v1803_v6 = vmul.f32 %v2260_v63, %v1802_v26  ;;  %v1824_v23 = vand.u32 2147483647, %v1709_v61 }
 0x30d   : > { %v2262_v42 = vpop.eup %2261 }
 0x30e   : > { %1881 = vmatmul.f32.gmra.mxu2 %v1799_v57  ;;  %v1804_v11 = vadd.f32 %v2260_v63, %v1803_v6  ;;  %v1816_v9 = vmul.f32 %v2262_v42, %v1709_v61  ;;  %vm1821_vm15 = vweird.f32 %v2262_v42  ;;  %vm1825_vm2 = vcmp.eq.f32.partialorder %v1824_v23, 8.507059e+37  ;;  %v1910_v7 = vpop.permute.xlu0 %1909 }
 0x30f   : > { %vm1822_vm1 = vmor %vm1820_vm0, %vm1821_vm15  ;;  %v1928_v46 = vsel %vm1923_vm3, %v1908_v2, %v1910_v7  ;;  %v1912_v31 = vpop.permute.xlu1 %1911 }
 0x310   : > { %v1808_v54 = vsel %vm1807_vm13, %v2260_v63, %v1804_v11  ;;  %v1817_v40 = vsub.f32 1.0, %v1816_v9  ;;  %v1914_v51 = vpop.permute.xlu2 %1913 }
 0x311   : > { %v1813_v37 = vsel %vm1810_vm14, %v1812_v21, %v1808_v54  ;;  %v1929_v61 = vsel %vm1923_vm3, %v1912_v31, %v1914_v51 }
 0x312   : > { %v1814_v38 = vmul.f32 %v1813_v37, %v3357_v10  ;;  %v1818_v14 = vmul.f32 %v2262_v42, %v1817_v40  ;;  %v2166_v10 = vld [vmem:[%s3406_s8] ss:$0 sm:$0xff] }
 0x314   : > { %v1819_v15 = vadd.f32 %v2262_v42, %v1818_v14 }
 0x316   : > { %1884 = vmatmul.f32.gmra.mxu2 %v1814_v38  ;;  %v1823_v55 = vsel %vm1822_vm1, %v2262_v42, %v1819_v15  ;;  %v1916_v53 = vpop.permute.xlu0 %1915 }
 0x317   : > { %v1828_v0 = vsel %vm1825_vm2, %v1827_v27, %v1823_v55  ;;  %v1918_v62 = vpop.permute.xlu1 %1917 }
 0x318   : > { %v1829_v59 = vmul.f32 %v1828_v0, %v3362_v22  ;;  %v1930_v35 = vsel %vm1923_vm3, %v1916_v53, %v1918_v62  ;;  %v1920_v29 = vpop.permute.xlu2 %1919 }
 0x31a   : > { %1887 = vmatmul.f32.vlgmr.msrb.gmra.mxu3 %v1829_v59 }
 0x31e   : > { %v1922_v26 = vpop.permute.xlu0 %1921 }
 0x31f   : > { %v1931_v6 = vsel %vm1923_vm3, %v1920_v29, %v1922_v26 }
 0x363   : > { %v1867_v19 = vpop.f32.mrf.mxu2 }
 0x364   : > { %v1868_v13 = vadd.f32 %v2166_v10, %v1867_v19 }
 0x366   : > { %v1940_v24 = vadd.f32 %v1924_v28, %v1868_v13 }
 0x368   : > { %1948 = vst [vmem:[%s3378_s30] sm:$0xff] %v1940_v24 }
 0x36b   : > { %v1870_v22 = vpop.f32.mrf.mxu2 }
 0x36c   : > { %v1871_v47 = vadd.f32 %v2166_v10, %v1870_v22 }
 0x36e   : > { %v1941_v45 = vadd.f32 %v1925_v3, %v1871_v47 }
 0x370   : > { %1949 = vst [vmem:[%s3378_s30 + $0x8] sm:$0xff] %v1941_v45 }
 0x373   : > { %v1873_v1 = vpop.f32.mrf.mxu2 }
 0x374   : > { %v1874_v20 = vadd.f32 %v2166_v10, %v1873_v1 }
 0x376   : > { %v1942_v32 = vadd.f32 %v1926_v12, %v1874_v20 }
 0x378   : > { %1950 = vst [vmem:[%s3378_s30 + $0x10] sm:$0xff] %v1942_v32 }
 0x37f   : > { %v1876_v43 = vpop.f32.mrf.mxu2 }
 0x380   : > { %v1877_v52 = vadd.f32 %v2166_v10, %v1876_v43 }
 0x382   : > { %v1943_v58 = vadd.f32 %v1927_v30, %v1877_v52 }
 0x384   : > { %1951 = vst [vmem:[%s3378_s30 + $0x18] sm:$0xff] %v1943_v58 }
 0x387   : > { %v1879_v25 = vpop.f32.mrf.mxu2 }
 0x388   : > { %v1880_v4 = vadd.f32 %v2166_v10, %v1879_v25 }
 0x38a   : > { %v1944_v5 = vadd.f32 %v1928_v46, %v1880_v4 }
 0x38c   : > { %1952 = vst [vmem:[%s3378_s30 + $0x20] sm:$0xff] %v1944_v5 }
 0x391   : > { %v1882_v41 = vpop.f32.mrf.mxu2 }
 0x392   : > { %v1883_v18 = vadd.f32 %v2166_v10, %v1882_v41 }
 0x394   : > { %v1945_v63 = vadd.f32 %v1929_v61, %v1883_v18 }
 0x396   : > { %1953 = vst [vmem:[%s3378_s30 + $0x28] sm:$0xff] %v1945_v63 }
 0x399   : > { %v1885_v60 = vpop.f32.mrf.mxu2 }
 0x39a   : > { %v1886_v50 = vadd.f32 %v2166_v10, %v1885_v60 }
 0x39c   : > { %v1946_v57 = vadd.f32 %v1930_v35, %v1886_v50 }
 0x39d   : > { %v1888_v39 = vpop.f32.mrf.mxu3 }
 0x39e   : > { %1954 = vst [vmem:[%s3378_s30 + $0x30] sm:$0xff] %v1946_v57  ;;  %v1889_v48 = vadd.f32 %v2166_v10, %v1888_v39 }
 0x3a0   : > { %v1947_v42 = vadd.f32 %v1931_v6, %v1889_v48 }
 0x3a2   : > { %1955 = vst [vmem:[%s3378_s30 + $0x38] sm:$0xff] %v1947_v42 }
 0x3a3 PF: > { %s20_s13 = sadd.s32 1, %s2269_s13  }
 0x3a4   : > { %p17_p4 = scmp.ge.s32.totalorder %s20_s13, 4  }
 0x3a6   :  { %19 = sbr.rel (!%p17_p4) target bundleno = 1 (0x1), region = 94 }

</bundles_post_ra>
